<compile_context>
chip_gen: v6e
topology: v6e:2x2x1
jax: 0.10.0
libtpu: 0.0.40
codegen_flags: <defaults>
</compile_context>

<pallas_src>
import jax
import jax.numpy as jnp
from jax.experimental import pallas as pl
from jax.experimental.pallas import tpu as pltpu


# ----------------------------------------------------------------------------- fused kernel

def _fused_gmic_kernel(px_ref, patches_ref,
                       bb_w_ref, bb_b_ref,
                       loc_w_ref, loc_b_ref,
                       attn_vu_ref, attn_w_ref,
                       fc1_w_ref, fc1_b_ref,
                       fc2_w_ref, fc2_b_ref,
                       feat_ref, logits_ref):
    bb = logits_ref.shape[0]              # images handled by this grid step
    hw = px_ref.shape[0] // bb            # 'pool' spatial positions per image
    p = patches_ref.shape[0] // bb        # detected boxes / patches per image
    n = bb * p

    # ---- 1) detector-backbone stand-in: 1x1-conv projection to 256 'pool' channels ----
    # K=3 contraction as VPU broadcast FMAs (MXU would be <3% utilized at K=3); kept f32.
    px = px_ref[...]                                               # [bb*hw, 3] f32
    bbw = bb_w_ref[...]                                            # [3, C]     f32
    acc = px[:, 0:1] * bbw[0:1, :]
    for k in range(1, px.shape[1]):
        acc = acc + px[:, k:k + 1] * bbw[k:k + 1, :]
    feat = jnp.maximum(acc + bb_b_ref[...], 0.0)                   # [bb*hw, C] lane-dense
    feat_ref[...] = feat

    # global_vec = per-image spatial mean, as a segment-average matmul (M=bb on the MXU)
    r = jax.lax.broadcasted_iota(jnp.int32, (bb, bb * hw), 0)
    c = jax.lax.broadcasted_iota(jnp.int32, (bb, bb * hw), 1)
    avg_bn = jnp.where((c >= r * hw) & (c < (r + 1) * hw), 1.0 / hw, 0.0)   # [bb, bb*hw]
    gvec = jnp.dot(avg_bn, feat, preferred_element_type=jnp.float32)        # [bb, C] f32

    # ---- 2) LocalNetwork: one [bb*P, K] @ [K, L] matmul serves every bag in the block ----
    # TODO(synk): LocalNetwork is a conv feature extractor in GMIC; stood in by flatten+Linear.
    h = jnp.dot(patches_ref[...], loc_w_ref[...],
                preferred_element_type=jnp.float32) + loc_b_ref[...]
    h = jnp.maximum(h, 0.0)                                        # [N, L] f32

    # ---- 3) gated MIL attention, softmax per image-bag via segment masks (VPU work) ----
    gates = jnp.dot(h.astype(jnp.bfloat16), attn_vu_ref[...],
                    preferred_element_type=jnp.float32)             # [N, 2D]
    d = attn_w_ref.shape[1]
    att_v = jnp.tanh(gates[:, :d])                                  # EUP
    att_u = jax.nn.sigmoid(gates[:, d:])                            # EUP
    scores = jnp.sum(att_v * att_u * attn_w_ref[...], axis=-1, keepdims=True)   # [N, 1]

    # Segment (bag-membership) masks built directly in both orientations -> no transposes.
    rn = jax.lax.broadcasted_iota(jnp.int32, (n, bb), 0)
    cn = jax.lax.broadcasted_iota(jnp.int32, (n, bb), 1)
    seg_nb_b = (rn >= cn * p) & (rn < (cn + 1) * p)                 # [N, bb] bool
    seg_nb = seg_nb_b.astype(jnp.float32)
    rb = jax.lax.broadcasted_iota(jnp.int32, (bb, n), 0)
    cb = jax.lax.broadcasted_iota(jnp.int32, (bb, n), 1)
    seg_bn = ((cb >= rb * p) & (cb < (rb + 1) * p)).astype(jnp.float32)   # [bb, N]

    masked = jnp.where(seg_nb_b, scores, jnp.float32(-1e30))        # [N, bb]
    bag_max = jnp.max(masked, axis=0, keepdims=True)                # [1, bb] (sublane reduce)
    row_max = jnp.sum(seg_nb * bag_max, axis=1, keepdims=True)      # [N, 1]
    e = jnp.exp(scores - row_max)                                   # [N, 1]
    bag_den = jnp.sum(seg_nb * e, axis=0, keepdims=True)            # [1, bb]
    row_den = jnp.sum(seg_nb * bag_den, axis=1, keepdims=True)      # [N, 1]
    attn = e * pl.reciprocal(row_den, approx=True)                  # per-bag softmax weights
    z = jnp.dot(seg_bn, attn * h, preferred_element_type=jnp.float32)   # [bb, L]

    # ---- 4) fusion classifier: cat([global_vec, z]) -> Linear(256+L,256) -> ReLU -> Linear ----
    fused = jnp.concatenate([gvec, z], axis=-1).astype(jnp.bfloat16)     # [bb, 256+L]
    hidden = jnp.maximum(
        jnp.dot(fused, fc1_w_ref[...], preferred_element_type=jnp.float32) + fc1_b_ref[...],
        0.0)                                                              # [bb, 256]
    # TODO(synk): nn.Dropout(0.5) is identity in eval mode; training-mode dropout not implemented.
    logits = jnp.dot(hidden.astype(jnp.bfloat16), fc2_w_ref[...],
                     preferred_element_type=jnp.float32) + fc2_b_ref[...]  # [bb, 128] padded
    logits_ref[...] = logits.astype(logits_ref.dtype)


def fused_gmic_forward(px, patches_flat, params, *, batch, num_patches, hw, block_batch):
    """px: [B*HW, 3] f32, patches_flat: [B*P, K] bf16 -> (feat [B*HW, 256], logits [B, 128])."""
    assert batch % block_batch == 0
    bb = block_batch
    grid = (batch // bb,)
    in_ch = px.shape[1]
    feat_ch = params["backbone_w"].shape[1]
    k_patch = patches_flat.shape[1]
    local_dim = params["local_w"].shape[1]
    two_d = params["attn_VU"].shape[1]
    f1_in, f1_out = params["fc1_w"].shape
    nc_pad = params["fc2_w"].shape[1]

    weights = (params["backbone_w"], params["backbone_b"],
               params["local_w"], params["local_b"],
               params["attn_VU"], params["attn_w"],
               params["fc1_w"], params["fc1_b"],
               params["fc2_w"], params["fc2_b"])

    def _w(arr):
        # Grid-resident weight: constant block index -> DMA'd once, stays in VMEM across steps.
        return pl.BlockSpec(arr.shape, lambda b: (0, 0))

    n_p = batch * num_patches
    flops = 2 * (batch * hw * in_ch * feat_ch          # backbone projection (VPU FMAs)
                 + batch * bb * hw * feat_ch           # segment-average matmul (global_vec)
                 + n_p * k_patch * local_dim           # LocalNetwork projection
                 + n_p * local_dim * two_d             # attention gates
                 + batch * bb * num_patches * local_dim  # z = seg @ (attn*h)
                 + batch * f1_in * f1_out              # fusion fc1
                 + batch * f1_out * nc_pad)            # fusion fc2
    transcendentals = n_p * (two_d + 1)                # tanh + sigmoid + exp per patch
    bytes_accessed = (px.size * 4 + patches_flat.size * 2
                      + sum(int(w.size) * w.dtype.itemsize for w in weights)
                      + batch * hw * feat_ch * 4 + batch * nc_pad * 4)
    cost = pl.CostEstimate(flops=int(flops), transcendentals=int(transcendentals),
                           bytes_accessed=int(bytes_accessed))

    return pl.pallas_call(
        _fused_gmic_kernel,
        grid=grid,
        out_shape=(jax.ShapeDtypeStruct((batch * hw, feat_ch), jnp.float32),
                   jax.ShapeDtypeStruct((batch, nc_pad), jnp.float32)),
        in_specs=[pl.BlockSpec((bb * hw, in_ch), lambda b: (b, 0)),
                  pl.BlockSpec((bb * num_patches, k_patch), lambda b: (b, 0))]
                 + [_w(w) for w in weights],
        out_specs=(pl.BlockSpec((bb * hw, feat_ch), lambda b: (b, 0)),
                   pl.BlockSpec((bb, nc_pad), lambda b: (b, 0))),
        compiler_params=pltpu.CompilerParams(dimension_semantics=("parallel",)),
        cost_estimate=cost,
    )(px, patches_flat, *weights)


# ----------------------------------------------------------------------------- params / forward

def init_params(key, *, in_ch=3, feat_ch=256, crop_shape=(16, 16),
                local_hidden_dim=32, attn_dim=16, num_classes=3, padded_classes=128):
    ks = jax.random.split(key, 8)
    s = 0.05
    local_in = in_ch * crop_shape[0] * crop_shape[1]
    fusion_in = feat_ch + local_hidden_dim
    attn_v = s * jax.random.normal(ks[2], (local_hidden_dim, attn_dim), jnp.float32)
    attn_u = s * jax.random.normal(ks[3], (local_hidden_dim, attn_dim), jnp.float32)
    fc2_w = s * jax.random.normal(ks[6], (256, num_classes), jnp.float32)
    fc2_w_pad = jnp.zeros((256, padded_classes), jnp.float32).at[:, :num_classes].set(fc2_w)
    return {
        # detector backbone stand-in (1x1 conv projection, VPU path -> keep f32)
        "backbone_w": s * jax.random.normal(ks[0], (in_ch, feat_ch), jnp.float32),
        "backbone_b": jnp.zeros((1, feat_ch), jnp.float32),
        # LocalNetwork stand-in (flatten-patch -> local_hidden_dim), MXU operand -> bf16
        "local_w": (s * jax.random.normal(ks[1], (local_in, local_hidden_dim), jnp.float32)
                    ).astype(jnp.bfloat16),
        "local_b": jnp.zeros((1, local_hidden_dim), jnp.float32),
        # AttentionModule: V and U concatenated -> one MXU push for both gates
        "attn_VU": jnp.concatenate([attn_v, attn_u], axis=1).astype(jnp.bfloat16),
        # score projection stored as a row: scores = sum((tanh*sig) * w, axis=-1)
        "attn_w": (s * jax.random.normal(ks[4], (attn_dim, 1), jnp.float32)).T,
        # fusion_classifier = Linear(256+L, 256) -> ReLU -> Dropout -> Linear(256, nc)
        "fc1_w": (s * jax.random.normal(ks[5], (fusion_in, 256), jnp.float32)).astype(jnp.bfloat16),
        "fc1_b": jnp.zeros((1, 256), jnp.float32),
        # fc2 padded to 128 output lanes (zeros) -> lane-dense, unmasked logits store
        "fc2_w": fc2_w_pad.astype(jnp.bfloat16),
        "fc2_b": jnp.zeros((1, padded_classes), jnp.float32),
    }


def combined_detector_gmic_forward(images, params, boxes, *, num_classes=3,
                                   block_batch=8, crop_shape=(16, 16)):
    """Eval-path forward of CombinedDetectorGMIC for a batch of images.

    images: [B, 3, H, W] float32; boxes: static list of (x1, y1, x2, y2) per image (stand-in
    for deterministic detections, same boxes applied to every image).
    """
    B, c_img, H, W = images.shape
    P = len(boxes)
    fh, fw = 4, 4

    # ---- detection_net stand-in preprocessing: one batched avg-pool to the 'pool' resolution ----
    pooled = images.reshape(B, c_img, fh, H // fh, fw, W // fw).mean(axis=(3, 5))   # [B,3,fh,fw]
    px = pooled.transpose(0, 2, 3, 1).reshape(B * fh * fw, c_img)                   # [B*HW, 3]

    # ---- patch extraction: ONE batched crop+resize per box across the whole batch ----
    # TODO(synk): jax.image.resize(bilinear) has no antialiasing, unlike torchvision TF.resize.
    per_box = []
    for (x1, y1, x2, y2) in boxes:
        crop = images[:, :, y1:y2, x1:x2]                                            # [B,3,h,w]
        crop = jax.image.resize(crop, (B, c_img, crop_shape[0], crop_shape[1]),
                                method="bilinear")
        per_box.append(crop)
    patches = jnp.stack(per_box, axis=1)                                             # [B,P,3,ch,cw]
    patches_flat = patches.reshape(B * P, -1).astype(jnp.bfloat16)                   # [B*P, K] bf16

    # ---- single fused, batched Pallas kernel: backbone proj + local net + attention + fusion ----
    feat_flat, logits_pad = fused_gmic_forward(px, patches_flat, params,
                                               batch=B, num_patches=P, hw=fh * fw,
                                               block_batch=block_batch)

    global_features = feat_flat.reshape(B, fh, fw, -1).transpose(0, 3, 1, 2)         # [B,256,4,4]
    final_logits = logits_pad[:, :num_classes]                                       # [B, nc]

    return {
        "detections": [{"boxes": jnp.asarray(boxes, jnp.float32)} for _ in range(B)],
        "features": global_features,
        "fusion_logits": final_logits,
    }


# ----------------------------------------------------------------------------- main

if __name__ == "__main__":
    key = jax.random.PRNGKey(0)
    k_img, k_par = jax.random.split(key)

    B = 16
    images = jax.random.uniform(k_img, (B, 3, 64, 64), jnp.float32)        # batched NCHW images
    params = init_params(k_par)
    boxes = ((4, 4, 36, 36), (10, 20, 42, 52), (0, 0, 32, 32))             # deterministic detections

    fwd = jax.jit(lambda imgs, prm: combined_detector_gmic_forward(imgs, prm, boxes))
    out = fwd(images, params)
    jax.block_until_ready(out["fusion_logits"])

    assert out["fusion_logits"].shape == (B, 3)
    assert out["features"].shape == (B, 256, 4, 4)
    print("KERNEL_OK")
</pallas_src>

<mosaic_0001>
module attributes {stable_mosaic.version = 11 : i64} {
  func.func @_fused_gmic_kernel(%arg0: i32, %arg1: memref<128x3xf32, #tpu.memory_space<vmem>>, %arg2: memref<24x768xbf16, #tpu.memory_space<vmem>>, %arg3: memref<3x256xf32, #tpu.memory_space<vmem>>, %arg4: memref<1x256xf32, #tpu.memory_space<vmem>>, %arg5: memref<768x32xbf16, #tpu.memory_space<vmem>>, %arg6: memref<1x32xf32, #tpu.memory_space<vmem>>, %arg7: memref<32x32xbf16, #tpu.memory_space<vmem>>, %arg8: memref<1x16xf32, #tpu.memory_space<vmem>>, %arg9: memref<288x256xbf16, #tpu.memory_space<vmem>>, %arg10: memref<1x256xf32, #tpu.memory_space<vmem>>, %arg11: memref<256x128xbf16, #tpu.memory_space<vmem>>, %arg12: memref<1x128xf32, #tpu.memory_space<vmem>>, %arg13: memref<128x256xf32, #tpu.memory_space<vmem>>, %arg14: memref<8x128xf32, #tpu.memory_space<vmem>>) attributes {dimension_semantics = [#tpu.dimension_semantics<parallel>], iteration_bounds = array<i64: 2>, scalar_prefetch = 0 : i64, scratch_operands = 0 : i64, tpu.core_type = #tpu.core_type<tc>, window_params = [{transform_indices = @transform_0, window_bounds = array<i64: 128, 3>}, {transform_indices = @transform_1, window_bounds = array<i64: 24, 768>}, {pipeline_mode = #tpu.pipeline_mode<synchronous>, transform_indices = @transform_2, window_bounds = array<i64: 3, 256>}, {pipeline_mode = #tpu.pipeline_mode<synchronous>, transform_indices = @transform_3, window_bounds = array<i64: 1, 256>}, {pipeline_mode = #tpu.pipeline_mode<synchronous>, transform_indices = @transform_4, window_bounds = array<i64: 768, 32>}, {pipeline_mode = #tpu.pipeline_mode<synchronous>, transform_indices = @transform_5, window_bounds = array<i64: 1, 32>}, {pipeline_mode = #tpu.pipeline_mode<synchronous>, transform_indices = @transform_6, window_bounds = array<i64: 32, 32>}, {pipeline_mode = #tpu.pipeline_mode<synchronous>, transform_indices = @transform_7, window_bounds = array<i64: 1, 16>}, {pipeline_mode = #tpu.pipeline_mode<synchronous>, transform_indices = @transform_8, window_bounds = array<i64: 288, 256>}, {pipeline_mode = #tpu.pipeline_mode<synchronous>, transform_indices = @transform_9, window_bounds = array<i64: 1, 256>}, {pipeline_mode = #tpu.pipeline_mode<synchronous>, transform_indices = @transform_10, window_bounds = array<i64: 256, 128>}, {pipeline_mode = #tpu.pipeline_mode<synchronous>, transform_indices = @transform_11, window_bounds = array<i64: 1, 128>}, {transform_indices = @transform_12, window_bounds = array<i64: 128, 256>}, {transform_indices = @transform_13, window_bounds = array<i64: 8, 128>}]} {
    %c0 = arith.constant 0 : index
    %c0_0 = arith.constant 0 : index
    %0 = vector.load %arg1[%c0, %c0_0] : memref<128x3xf32, #tpu.memory_space<vmem>>, vector<128x3xf32>
    %c0_1 = arith.constant 0 : index
    %c0_2 = arith.constant 0 : index
    %1 = vector.load %arg3[%c0_1, %c0_2] : memref<3x256xf32, #tpu.memory_space<vmem>>, vector<3x256xf32>
    %2 = vector.extract_strided_slice %0 {offsets = [0, 0], sizes = [128, 1], strides = [1, 1]} : vector<128x3xf32> to vector<128x1xf32>
    %3 = vector.extract_strided_slice %1 {offsets = [0, 0], sizes = [1, 256], strides = [1, 1]} : vector<3x256xf32> to vector<1x256xf32>
    %4 = vector.broadcast %2 : vector<128x1xf32> to vector<128x256xf32>
    %5 = vector.broadcast %3 : vector<1x256xf32> to vector<128x256xf32>
    %6 = arith.mulf %4, %5 : vector<128x256xf32>
    %7 = vector.extract_strided_slice %0 {offsets = [0, 1], sizes = [128, 1], strides = [1, 1]} : vector<128x3xf32> to vector<128x1xf32>
    %8 = vector.extract_strided_slice %1 {offsets = [1, 0], sizes = [1, 256], strides = [1, 1]} : vector<3x256xf32> to vector<1x256xf32>
    %9 = vector.broadcast %7 : vector<128x1xf32> to vector<128x256xf32>
    %10 = vector.broadcast %8 : vector<1x256xf32> to vector<128x256xf32>
    %11 = arith.mulf %9, %10 : vector<128x256xf32>
    %12 = arith.addf %6, %11 : vector<128x256xf32>
    %13 = vector.extract_strided_slice %0 {offsets = [0, 2], sizes = [128, 1], strides = [1, 1]} : vector<128x3xf32> to vector<128x1xf32>
    %14 = vector.extract_strided_slice %1 {offsets = [2, 0], sizes = [1, 256], strides = [1, 1]} : vector<3x256xf32> to vector<1x256xf32>
    %15 = vector.broadcast %13 : vector<128x1xf32> to vector<128x256xf32>
    %16 = vector.broadcast %14 : vector<1x256xf32> to vector<128x256xf32>
    %17 = arith.mulf %15, %16 : vector<128x256xf32>
    %18 = arith.addf %12, %17 : vector<128x256xf32>
    %c0_3 = arith.constant 0 : index
    %c0_4 = arith.constant 0 : index
    %19 = vector.load %arg4[%c0_3, %c0_4] : memref<1x256xf32, #tpu.memory_space<vmem>>, vector<1x256xf32>
    %20 = vector.broadcast %19 : vector<1x256xf32> to vector<128x256xf32>
    %21 = arith.addf %18, %20 : vector<128x256xf32>
    %cst = arith.constant 0.000000e+00 : f32
    %22 = vector.broadcast %cst : f32 to vector<128x256xf32>
    %23 = arith.maximumf %21, %22 : vector<128x256xf32>
    %c0_5 = arith.constant 0 : index
    %c0_6 = arith.constant 0 : index
    %24 = vector.load %arg13[%c0_5, %c0_6] : memref<128x256xf32, #tpu.memory_space<vmem>>, vector<128x256xf32>
    tpu.vector_store %arg13[%c0_5, %c0_6], %23 {strides = array<i32>} : memref<128x256xf32, #tpu.memory_space<vmem>>, vector<128x256xf32>,
    %25 = tpu.iota {dimensions = array<i32: 0>} : vector<8x128xi32>
    %26 = tpu.iota {dimensions = array<i32: 1>} : vector<8x128xi32>
    %c16_i32 = arith.constant 16 : i32
    %27 = vector.broadcast %c16_i32 : i32 to vector<8x128xi32>
    %28 = arith.muli %25, %27 : vector<8x128xi32>
    %29 = arith.cmpi sge, %26, %28 : vector<8x128xi32>
    %c1_i32 = arith.constant 1 : i32
    %30 = vector.broadcast %c1_i32 : i32 to vector<8x128xi32>
    %31 = arith.addi %25, %30 : vector<8x128xi32>
    %c16_i32_7 = arith.constant 16 : i32
    %32 = vector.broadcast %c16_i32_7 : i32 to vector<8x128xi32>
    %33 = arith.muli %31, %32 : vector<8x128xi32>
    %34 = arith.cmpi slt, %26, %33 : vector<8x128xi32>
    %35 = arith.andi %29, %34 : vector<8x128xi1>
    %cst_8 = arith.constant 6.250000e-02 : f32
    %cst_9 = arith.constant 0.000000e+00 : f32
    %36 = vector.broadcast %cst_8 : f32 to vector<8x128xf32>
    %37 = vector.broadcast %cst_9 : f32 to vector<8x128xf32>
    %38 = arith.select %35, %36, %37 : vector<8x128xi1>, vector<8x128xf32>
    %cst_10 = arith.constant dense<0.000000e+00> : vector<8x256xf32>
    %39 = tpu.matmul %38, %23, %cst_10 {dimension_numbers = #tpu.dot_dimension_numbers<[1], [0], [0], [1], [0, 0, 1, 1], [], []>} : vector<8x128xf32>, vector<128x256xf32>, vector<8x256xf32> -> vector<8x256xf32>
    %c0_11 = arith.constant 0 : index
    %c0_12 = arith.constant 0 : index
    %40 = vector.load %arg2[%c0_11, %c0_12] : memref<24x768xbf16, #tpu.memory_space<vmem>>, vector<24x768xbf16>
    %c0_13 = arith.constant 0 : index
    %c0_14 = arith.constant 0 : index
    %41 = vector.load %arg5[%c0_13, %c0_14] : memref<768x32xbf16, #tpu.memory_space<vmem>>, vector<768x32xbf16>
    %cst_15 = arith.constant dense<0.000000e+00> : vector<24x32xf32>
    %42 = tpu.matmul %40, %41, %cst_15 {dimension_numbers = #tpu.dot_dimension_numbers<[1], [0], [0], [1], [0, 0, 1, 1], [], []>} : vector<24x768xbf16>, vector<768x32xbf16>, vector<24x32xf32> -> vector<24x32xf32>
    %c0_16 = arith.constant 0 : index
    %c0_17 = arith.constant 0 : index
    %43 = vector.load %arg6[%c0_16, %c0_17] : memref<1x32xf32, #tpu.memory_space<vmem>>, vector<1x32xf32>
    %44 = vector.broadcast %43 : vector<1x32xf32> to vector<24x32xf32>
    %45 = arith.addf %42, %44 : vector<24x32xf32>
    %cst_18 = arith.constant 0.000000e+00 : f32
    %46 = vector.broadcast %cst_18 : f32 to vector<24x32xf32>
    %47 = arith.maximumf %45, %46 : vector<24x32xf32>
    %48 = arith.truncf %47 : vector<24x32xf32> to vector<24x32xbf16>
    %c0_19 = arith.constant 0 : index
    %c0_20 = arith.constant 0 : index
    %49 = vector.load %arg7[%c0_19, %c0_20] : memref<32x32xbf16, #tpu.memory_space<vmem>>, vector<32x32xbf16>
    %cst_21 = arith.constant dense<0.000000e+00> : vector<24x32xf32>
    %50 = tpu.matmul %48, %49, %cst_21 {dimension_numbers = #tpu.dot_dimension_numbers<[1], [0], [0], [1], [0, 0, 1, 1], [], []>} : vector<24x32xbf16>, vector<32x32xbf16>, vector<24x32xf32> -> vector<24x32xf32>
    %51 = vector.extract_strided_slice %50 {offsets = [0, 0], sizes = [24, 16], strides = [1, 1]} : vector<24x32xf32> to vector<24x16xf32>
    %52 = math.tanh %51 : vector<24x16xf32>
    %53 = vector.extract_strided_slice %50 {offsets = [0, 16], sizes = [24, 16], strides = [1, 1]} : vector<24x32xf32> to vector<24x16xf32>
    %54 = arith.negf %53 : vector<24x16xf32>
    %55 = math.exp %54 : vector<24x16xf32>
    %cst_22 = arith.constant 1.000000e+00 : f32
    %56 = vector.broadcast %cst_22 : f32 to vector<24x16xf32>
    %57 = arith.addf %56, %55 : vector<24x16xf32>
    %58 = arith.divf %56, %57 : vector<24x16xf32>
    %59 = arith.mulf %52, %58 : vector<24x16xf32>
    %c0_23 = arith.constant 0 : index
    %c0_24 = arith.constant 0 : index
    %60 = vector.load %arg8[%c0_23, %c0_24] : memref<1x16xf32, #tpu.memory_space<vmem>>, vector<1x16xf32>
    %61 = vector.broadcast %60 : vector<1x16xf32> to vector<24x16xf32>
    %62 = arith.mulf %59, %61 : vector<24x16xf32>
    %cst_25 = arith.constant dense<0.000000e+00> : vector<24xf32>
    %63 = vector.multi_reduction <add>, %62, %cst_25 [1] : vector<24x16xf32> to vector<24xf32>
    %64 = vector.shape_cast %63 : vector<24xf32> to vector<24x1xf32>
    %65 = tpu.iota {dimensions = array<i32: 0>} : vector<24x8xi32>
    %66 = tpu.iota {dimensions = array<i32: 1>} : vector<24x8xi32>
    %c3_i32 = arith.constant 3 : i32
    %67 = vector.broadcast %c3_i32 : i32 to vector<24x8xi32>
    %68 = arith.muli %66, %67 : vector<24x8xi32>
    %69 = arith.cmpi sge, %65, %68 : vector<24x8xi32>
    %c1_i32_26 = arith.constant 1 : i32
    %70 = vector.broadcast %c1_i32_26 : i32 to vector<24x8xi32>
    %71 = arith.addi %66, %70 : vector<24x8xi32>
    %c3_i32_27 = arith.constant 3 : i32
    %72 = vector.broadcast %c3_i32_27 : i32 to vector<24x8xi32>
    %73 = arith.muli %71, %72 : vector<24x8xi32>
    %74 = arith.cmpi slt, %65, %73 : vector<24x8xi32>
    %75 = arith.andi %69, %74 : vector<24x8xi1>
    %76 = arith.extui %75 : vector<24x8xi1> to vector<24x8xi32>
    %77 = arith.sitofp %76 : vector<24x8xi32> to vector<24x8xf32>
    %78 = tpu.iota {dimensions = array<i32: 0>} : vector<8x24xi32>
    %79 = tpu.iota {dimensions = array<i32: 1>} : vector<8x24xi32>
    %c3_i32_28 = arith.constant 3 : i32
    %80 = vector.broadcast %c3_i32_28 : i32 to vector<8x24xi32>
    %81 = arith.muli %78, %80 : vector<8x24xi32>
    %82 = arith.cmpi sge, %79, %81 : vector<8x24xi32>
    %c1_i32_29 = arith.constant 1 : i32
    %83 = vector.broadcast %c1_i32_29 : i32 to vector<8x24xi32>
    %84 = arith.addi %78, %83 : vector<8x24xi32>
    %c3_i32_30 = arith.constant 3 : i32
    %85 = vector.broadcast %c3_i32_30 : i32 to vector<8x24xi32>
    %86 = arith.muli %84, %85 : vector<8x24xi32>
    %87 = arith.cmpi slt, %79, %86 : vector<8x24xi32>
    %88 = arith.andi %82, %87 : vector<8x24xi1>
    %89 = arith.extui %88 : vector<8x24xi1> to vector<8x24xi32>
    %90 = arith.sitofp %89 : vector<8x24xi32> to vector<8x24xf32>
    %cst_31 = arith.constant -1.000000e+30 : f32
    %91 = vector.shape_cast %64 : vector<24x1xf32> to vector<24x1xf32>
    %92 = vector.broadcast %91 : vector<24x1xf32> to vector<24x8xf32>
    %93 = vector.broadcast %cst_31 : f32 to vector<24x8xf32>
    %94 = arith.select %75, %92, %93 : vector<24x8xi1>, vector<24x8xf32>
    %cst_32 = arith.constant dense<0xFF800000> : vector<8xf32>
    %95 = vector.multi_reduction <maximumf>, %94, %cst_32 [0] : vector<24x8xf32> to vector<8xf32>
    %96 = vector.shape_cast %95 : vector<8xf32> to vector<1x8xf32>
    %97 = vector.broadcast %96 : vector<1x8xf32> to vector<24x8xf32>
    %98 = arith.mulf %77, %97 : vector<24x8xf32>
    %cst_33 = arith.constant dense<0.000000e+00> : vector<24xf32>
    %99 = vector.multi_reduction <add>, %98, %cst_33 [1] : vector<24x8xf32> to vector<24xf32>
    %100 = vector.shape_cast %99 : vector<24xf32> to vector<24x1xf32>
    %101 = arith.subf %64, %100 : vector<24x1xf32>
    %102 = math.exp %101 : vector<24x1xf32>
    %103 = vector.broadcast %102 : vector<24x1xf32> to vector<24x8xf32>
    %104 = arith.mulf %77, %103 : vector<24x8xf32>
    %cst_34 = arith.constant dense<0.000000e+00> : vector<8xf32>
    %105 = vector.multi_reduction <add>, %104, %cst_34 [0] : vector<24x8xf32> to vector<8xf32>
    %106 = vector.shape_cast %105 : vector<8xf32> to vector<1x8xf32>
    %107 = vector.broadcast %106 : vector<1x8xf32> to vector<24x8xf32>
    %108 = arith.mulf %77, %107 : vector<24x8xf32>
    %cst_35 = arith.constant dense<0.000000e+00> : vector<24xf32>
    %109 = vector.multi_reduction <add>, %108, %cst_35 [1] : vector<24x8xf32> to vector<24xf32>
    %110 = vector.shape_cast %109 : vector<24xf32> to vector<24x1xf32>
    %111 = tpu.reciprocal %110 {approx = true} : vector<24x1xf32> -> vector<24x1xf32>
    %112 = arith.mulf %102, %111 : vector<24x1xf32>
    %113 = vector.broadcast %112 : vector<24x1xf32> to vector<24x32xf32>
    %114 = arith.mulf %113, %47 : vector<24x32xf32>
    %cst_36 = arith.constant dense<0.000000e+00> : vector<8x32xf32>
    %115 = tpu.matmul %90, %114, %cst_36 {dimension_numbers = #tpu.dot_dimension_numbers<[1], [0], [0], [1], [0, 0, 1, 1], [], []>} : vector<8x24xf32>, vector<24x32xf32>, vector<8x32xf32> -> vector<8x32xf32>
    %116 = tpu.concatenate %39, %115 in 1 : vector<8x256xf32>, vector<8x32xf32> -> vector<8x288xf32>
    %117 = arith.truncf %116 : vector<8x288xf32> to vector<8x288xbf16>
    %c0_37 = arith.constant 0 : index
    %c0_38 = arith.constant 0 : index
    %118 = vector.load %arg9[%c0_37, %c0_38] : memref<288x256xbf16, #tpu.memory_space<vmem>>, vector<288x256xbf16>
    %cst_39 = arith.constant dense<0.000000e+00> : vector<8x256xf32>
    %119 = tpu.matmul %117, %118, %cst_39 {dimension_numbers = #tpu.dot_dimension_numbers<[1], [0], [0], [1], [0, 0, 1, 1], [], []>} : vector<8x288xbf16>, vector<288x256xbf16>, vector<8x256xf32> -> vector<8x256xf32>
    %c0_40 = arith.constant 0 : index
    %c0_41 = arith.constant 0 : index
    %120 = vector.load %arg10[%c0_40, %c0_41] : memref<1x256xf32, #tpu.memory_space<vmem>>, vector<1x256xf32>
    %121 = vector.broadcast %120 : vector<1x256xf32> to vector<8x256xf32>
    %122 = arith.addf %119, %121 : vector<8x256xf32>
    %cst_42 = arith.constant 0.000000e+00 : f32
    %123 = vector.broadcast %cst_42 : f32 to vector<8x256xf32>
    %124 = arith.maximumf %122, %123 : vector<8x256xf32>
    %125 = arith.truncf %124 : vector<8x256xf32> to vector<8x256xbf16>
    %c0_43 = arith.constant 0 : index
    %c0_44 = arith.constant 0 : index
    %126 = vector.load %arg11[%c0_43, %c0_44] : memref<256x128xbf16, #tpu.memory_space<vmem>>, vector<256x128xbf16>
    %cst_45 = arith.constant dense<0.000000e+00> : vector<8x128xf32>
    %127 = tpu.matmul %125, %126, %cst_45 {dimension_numbers = #tpu.dot_dimension_numbers<[1], [0], [0], [1], [0, 0, 1, 1], [], []>} : vector<8x256xbf16>, vector<256x128xbf16>, vector<8x128xf32> -> vector<8x128xf32>
    %c0_46 = arith.constant 0 : index
    %c0_47 = arith.constant 0 : index
    %128 = vector.load %arg12[%c0_46, %c0_47] : memref<1x128xf32, #tpu.memory_space<vmem>>, vector<1x128xf32>
    %129 = vector.broadcast %128 : vector<1x128xf32> to vector<8x128xf32>
    %130 = arith.addf %127, %129 : vector<8x128xf32>
    %c0_48 = arith.constant 0 : index
    %c0_49 = arith.constant 0 : index
    %131 = vector.load %arg14[%c0_48, %c0_49] : memref<8x128xf32, #tpu.memory_space<vmem>>, vector<8x128xf32>
    tpu.vector_store %arg14[%c0_48, %c0_49], %130 {strides = array<i32>} : memref<8x128xf32, #tpu.memory_space<vmem>>, vector<8x128xf32>,
    return
  }
  func.func @transform_0(%arg0: i32) -> (i32, i32) {
    %c0_i32 = arith.constant 0 : i32
    %c0_i32_0 = arith.constant 0 : i32
    return %arg0, %c0_i32 : i32, i32
  }
  func.func @transform_1(%arg0: i32) -> (i32, i32) {
    %c0_i32 = arith.constant 0 : i32
    %c0_i32_0 = arith.constant 0 : i32
    return %arg0, %c0_i32 : i32, i32
  }
  func.func @transform_2(%arg0: i32) -> (i32, i32) {
    %c0_i32 = arith.constant 0 : i32
    %c0_i32_0 = arith.constant 0 : i32
    %c0_i32_1 = arith.constant 0 : i32
    return %c0_i32, %c0_i32_0 : i32, i32
  }
  func.func @transform_3(%arg0: i32) -> (i32, i32) {
    %c0_i32 = arith.constant 0 : i32
    %c0_i32_0 = arith.constant 0 : i32
    %c0_i32_1 = arith.constant 0 : i32
    return %c0_i32, %c0_i32_0 : i32, i32
  }
  func.func @transform_4(%arg0: i32) -> (i32, i32) {
    %c0_i32 = arith.constant 0 : i32
    %c0_i32_0 = arith.constant 0 : i32
    %c0_i32_1 = arith.constant 0 : i32
    return %c0_i32, %c0_i32_0 : i32, i32
  }
  func.func @transform_5(%arg0: i32) -> (i32, i32) {
    %c0_i32 = arith.constant 0 : i32
    %c0_i32_0 = arith.constant 0 : i32
    %c0_i32_1 = arith.constant 0 : i32
    return %c0_i32, %c0_i32_0 : i32, i32
  }
  func.func @transform_6(%arg0: i32) -> (i32, i32) {
    %c0_i32 = arith.constant 0 : i32
    %c0_i32_0 = arith.constant 0 : i32
    %c0_i32_1 = arith.constant 0 : i32
    return %c0_i32, %c0_i32_0 : i32, i32
  }
  func.func @transform_7(%arg0: i32) -> (i32, i32) {
    %c0_i32 = arith.constant 0 : i32
    %c0_i32_0 = arith.constant 0 : i32
    %c0_i32_1 = arith.constant 0 : i32
    return %c0_i32, %c0_i32_0 : i32, i32
  }
  func.func @transform_8(%arg0: i32) -> (i32, i32) {
    %c0_i32 = arith.constant 0 : i32
    %c0_i32_0 = arith.constant 0 : i32
    %c0_i32_1 = arith.constant 0 : i32
    return %c0_i32, %c0_i32_0 : i32, i32
  }
  func.func @transform_9(%arg0: i32) -> (i32, i32) {
    %c0_i32 = arith.constant 0 : i32
    %c0_i32_0 = arith.constant 0 : i32
    %c0_i32_1 = arith.constant 0 : i32
    return %c0_i32, %c0_i32_0 : i32, i32
  }
  func.func @transform_10(%arg0: i32) -> (i32, i32) {
    %c0_i32 = arith.constant 0 : i32
    %c0_i32_0 = arith.constant 0 : i32
    %c0_i32_1 = arith.constant 0 : i32
    return %c0_i32, %c0_i32_0 : i32, i32
  }
  func.func @transform_11(%arg0: i32) -> (i32, i32) {
    %c0_i32 = arith.constant 0 : i32
    %c0_i32_0 = arith.constant 0 : i32
    %c0_i32_1 = arith.constant 0 : i32
    return %c0_i32, %c0_i32_0 : i32, i32
  }
  func.func @transform_12(%arg0: i32) -> (i32, i32) {
    %c0_i32 = arith.constant 0 : i32
    %c0_i32_0 = arith.constant 0 : i32
    return %arg0, %c0_i32 : i32, i32
  }
  func.func @transform_13(%arg0: i32) -> (i32, i32) {
    %c0_i32 = arith.constant 0 : i32
    %c0_i32_0 = arith.constant 0 : i32
    return %arg0, %c0_i32 : i32, i32
  }
}

</mosaic_0001>

<bundles_post_ra>
// kernel: _lambda_.1
= control target key start
LH: loop header
LB: loop body
LE: loop exit
PB: predicated region body
PF: predicated region fallthrough
CT: control target
= control target key end

     0   :  { %s3183_s25 = smov 0   ;;  %s3984_s0 = inlined_call_operand.vmem [shape: f32[256,3], index: 0, kind: input, shape index: {}]   ;;  %s3985_s1 = inlined_call_operand.vmem [shape: bf16[48,768], index: 1, kind: input, shape index: {}]   ;;  %s3986_s2 = inlined_call_operand.vmem [shape: f32[3,256], index: 2, kind: input, shape index: {}]   ;;  %s3987_s3 = inlined_call_operand.vmem [shape: f32[1,256], index: 3, kind: input, shape index: {}]   ;;  %s3988_s4 = inlined_call_operand.vmem [shape: bf16[768,32], index: 4, kind: input, shape index: {}]   ;;  %s3989_s5 = inlined_call_operand.vmem [shape: f32[1,32], index: 5, kind: input, shape index: {}]   ;;  %s3990_s6 = inlined_call_operand.vmem [shape: bf16[32,32], index: 6, kind: input, shape index: {}]   ;;  %s3991_s7 = inlined_call_operand.vmem [shape: f32[1,16], index: 7, kind: input, shape index: {}]   ;;  %s3992_s8 = inlined_call_operand.vmem [shape: bf16[288,256], index: 8, kind: input, shape index: {}]   ;;  %s3993_s9 = inlined_call_operand.vmem [shape: f32[1,256], index: 9, kind: input, shape index: {}]   ;;  %s3994_s10 = inlined_call_operand.vmem [shape: bf16[256,128], index: 10, kind: input, shape index: {}]   ;;  %s3995_s11 = inlined_call_operand.vmem [shape: f32[1,128], index: 11, kind: input, shape index: {}]   ;;  %s3996_s12 = inlined_call_operand.vmem [shape: f32[256,256], index: 12, kind: output, shape index: {0}]   ;;  %s3997_s13 = inlined_call_operand.vmem [shape: f32[16,128], index: 13, kind: output, shape index: {1}]  }
   0x1 LB: > { %s3189_s26 = sadd.s32 4294967295, %s3104_s25   ;;  %p2613_p0 = scmp.ge.s32.totalorder %s3104_s25, 1  ;;  %s3104_s25 = sphi %s3183_s25, %s24_s25  }
   0x2   : > { %p403_p1 = scmp.lt.s32.totalorder %s3104_s25, 3 }
   0x4   : > { %p404_p2 = pnand %p2613_p0, %p403_p1 }
   0x5   : > { %s2614_s27 = sshll.u32 (!%p404_p2), %s3189_s26, 4  ;;  %s464_s30 = smul.u32 (!%p404_p2), 3, %s3189_s26 }
   0x6   : > { %407 = sbr.rel (%p404_p2) target bundleno = 1983 (0x7bf), region = 68  ;;  %p459_p3 = scmp.lt.s32.totalorder (!%p404_p2), %s2614_s27, 31 }
   0x7   : > { %p465_p4 = scmp.lt.s32.totalorder (!%p404_p2), %s464_s30, 5  ;;  %p478_p5 = scmp.lt.s32.totalorder (!%p404_p2), %s3189_s26, 1 }
   0xb   : > { %v3106_v0 = vmov 1   ;;  %v3107_v1 = vmov 0   ;;  %s4005_s27 = smov (!%p459_p3, %s2614_s27), 31  ;;  %v3108_v7 = vmov 2   ;;  %v2933_v18 = vld [vmem:[%s3988_s4 + $0x78] sm:$0xff]   ;;  %v2935_v20 = vld [vmem:[%s3988_s4 + $0x70] sm:$0xff]   ;;  %v581_v26 = vlaneseq }
   0xc   : > { %2900 = vset.pattern.permute.xlu0 %v3106_v0  ;;  %2901 = vset.pattern.permute.xlu1 %v3107_v1  ;;  %s2615_s28 = sshll.u32 %s4005_s27, 3  ;;  %v2934_v19 = vld [vmem:[%s3988_s4 + $0x38] sm:$0xff]   ;;  %v2936_v21 = vld [vmem:[%s3988_s4 + $0x30] sm:$0xff]   ;;  %v2937_v22 = vld [vmem:[%s3988_s4 + $0x68] sm:$0xff]   ;;  %s4007_s30 = smov (!%p465_p4, %s464_s30), 5  ;;  %vm1729_vm3 = vcmask 261120  }
   0xd   : > { %s3202_s14 = scalar_lea.vmem %s3984_s0, %s2615_s28  ;;  %2753 = vmatprep.subr.bf16.mxu1 %v2933_v18  ;;  %v2938_v24 = vld [vmem:[%s3988_s4 + $0x28] sm:$0xff]   ;;  %v2939_v25 = vld [vmem:[%s3988_s4 + $0x60] sm:$0xff]   ;;  %v2941_v30 = vld [vmem:[%s3988_s4 + $0x58] sm:$0xff]   ;;  %v3294_v31 = vshrl.u32 %v581_v26, 7  ;;  %s2884_s22 = smul.u32 24, %s4007_s30  ;;  %vm1830_vm4 = vcmask 130048  }
   0xe   : > { %v498_v2 = vld [vmem:[%s3202_s14 + $0x78] sm:$0xff]  ;;  %v497_v3 = vld [vmem:[%s3202_s14 + $0x70] sm:$0xff]  ;;  %v492_v5 = vld [vmem:[%s3202_s14 + $0x48] sm:$0xff]  ;;  %2754 = vmatpush3.bf16.msra.mxu1 %v2934_v19  ;;  %vm1870_vm13 = vcmask 64512   ;;  %vm3112_vm15 = vmmov 0   ;;  %s4009_s26 = smov (!%p478_p5, %s3189_s26), 1 }
   0xf   : > { %692 = vperm.xlu0 %2900, %v498_v2   ;;  %572 = vperm.xlu1 %2901, %v497_v3   ;;  %v493_v4 = vld [vmem:[%s3202_s14 + $0x50] sm:$0xff]  ;;  %v3210_v6 = vld [vmem:[%s3202_s14 + $0x28] sm:$0xff]  ;;  %v3215_v9 = vld [vmem:[%s3202_s14 + $0x20] sm:$0xff]  ;;  %v3300_v33 = vsub.s32 1, %v3294_v31  ;;  %v701_v35 = vsub.s32 5, %v3294_v31  ;;  %v3312_v39 = vsub.s32 0, %v3294_v31  ;;  %s3368_s30 = scalar_lea.vmem %s3985_s1, %s2884_s22 }
  0x10   : > { %v496_v8 = vld [vmem:[%s3202_s14 + $0x68] sm:$0xff]  ;;  %v495_v10 = vld [vmem:[%s3202_s14 + $0x60] sm:$0xff]  ;;  %v494_v11 = vld [vmem:[%s3202_s14 + $0x58] sm:$0xff]  ;;  %2755 = vmatprep.subr.bf16.mxu1 %v2935_v20  ;;  %v587_v41 = vsub.s32 4, %v3294_v31  ;;  %v843_v47 = vsub.s32 2, %v3294_v31  ;;  %v847_v51 = vsub.s32 6, %v3294_v31 }
  0x11   : > { %v491_v12 = vld [vmem:[%s3202_s14 + $0x40] sm:$0xff]  ;;  %v490_v13 = vld [vmem:[%s3202_s14 + $0x38] sm:$0xff]  ;;  %v485_v15 = vld [vmem:[%s3202_s14 + $0x10] sm:$0xff]  ;;  %s2752_s22 = sshll.u32 %s4005_s27, 4 }
  0x12   : > { %v486_v14 = vld [vmem:[%s3202_s14 + $0x18] sm:$0xff]  ;;  %v489_v16 = vld [vmem:[%s3202_s14 + $0x30] sm:$0xff]  ;;  %v3241_v17 = vld [vmem:[%s3202_s14] sm:$0xff]  ;;  %2756 = vmatpush3.bf16.msra.mxu1 %v2936_v21  ;;  %s3425_s29 = scalar_lea.vmem %s3996_s12, %s2752_s22  ;;  %s3111_s22 = smov 112  }
  0x13   : > { %2902 = vset.pattern.permute.xlu1 %v3106_v0  ;;  %672 = vperm.xlu0 %2900, %v493_v4   ;;  %v484_v23 = vld [vmem:[%s3202_s14 + $0x8] sm:$0xff]  ;;  %v2940_v27 = vld [vmem:[%s3988_s4 + $0x20] sm:$0xff]   ;;  %v2942_v32 = vld [vmem:[%s3988_s4 + $0x18] sm:$0xff]  }
  0x14   : > { %688 = vperm.xlu1 %2902, %v497_v3   ;;  %2757 = vmatprep.subr.bf16.mxu1 %v2937_v22  ;;  %v2943_v37 = vld [vmem:[%s3988_s4 + $0x50] sm:$0xff]   ;;  %v499_v40 = vld [vmem:[%s3986_s2] sm:$0x77]  ;;  %v2945_v45 = vld [vmem:[%s3988_s4 + $0x48] sm:$0xff]  }
  0x15   : > { %v2944_v38 = vld [vmem:[%s3988_s4 + $0x10] sm:$0xff]   ;;  %v698_v42 = vrot.slane %v499_v40, %v3300_v33  ;;  %v702_v44 = vrot.slane %v499_v40, %v701_v35  ;;  %v584_v46 = vrot.slane %v499_v40, %v3312_v39  ;;  %v2946_v49 = vld [vmem:[%s3988_s4 + $0x8] sm:$0xff]   ;;  %v588_v50 = vrot.slane %v499_v40, %v587_v41  ;;  %v2947_v55 = vld [vmem:[%s3988_s4 + $0x40] sm:$0xff]  }
  0x16   : > { %2758 = vmatpush3.bf16.msra.mxu1 %v2938_v24  ;;  %v844_v57 = vrot.slane %v499_v40, %v843_v47  ;;  %v2948_v58 = vld [vmem:[%s3988_s4] sm:$0xff]   ;;  %v848_v60 = vrot.slane %v499_v40, %v847_v51  ;;  %v2955_v21 = vld [vmem:[%s3988_s4 + $0x170] sm:$0xff]   ;;  %v3109_v24 = vmov 0.0  }
  0x17   : > { %668 = vperm.xlu0 %2900, %v492_v5   ;;  %2759 = vmatprep.subr.bf16.mxu1 %v2939_v25  ;;  %v3337_v52 = vrot.slane %v698_v42, %v3300_v33  ;;  %v3342_v54 = vrot.slane %v702_v44, %v3300_v33  ;;  %v3348_v56 = vrot.slane %v584_v46, %v3312_v39  ;;  %v2957_v25 = vld [vmem:[%s3988_s4 + $0x130] sm:$0xff]   ;;  %v2961_v42 = vld [vmem:[%s3988_s4 + $0x128] sm:$0xff]  }
  0x18   : > { %2903 = vset.pattern.permute.xlu1 %v3108_v7  ;;  %v3354_v59 = vrot.slane %v588_v50, %v3312_v39  ;;  %1106 = vmatprep.mubr.f32.mxu0 %v3109_v24 }
  0x19   : > { %838 = vperm.xlu1 %2903, %v498_v2  }
  0x1a   : > { %2760 = vmatpush3.bf16.msra.mxu1 %v2940_v27 }
  0x1b   : > { %652 = vperm.xlu0 %2900, %v3210_v6   ;;  %2761 = vmatprep.subr.bf16.mxu1 %v2941_v30 }
  0x1d   : > { %2904 = vset.pattern.permute.xlu1 %v3106_v0 }
  0x1e   : > { %684 = vperm.xlu1 %2904, %v496_v8   ;;  %2762 = vmatpush3.bf16.msra.mxu1 %v2942_v32  ;;  %v2959_v32 = vld [vmem:[%s3988_s4 + $0x168] sm:$0xff]  }
  0x1f   : > { %648 = vperm.xlu0 %2900, %v3215_v9   ;;  %2763 = vmatprep.subr.bf16.mxu1 %v2943_v37 }
  0x22   : > { %2905 = vset.pattern.permute.xlu1 %v3108_v7  ;;  %2764 = vmatpush3.bf16.msra.mxu1 %v2944_v38 }
  0x23   : > { %834 = vperm.xlu1 %2905, %v497_v3   ;;  %2921 = vset.pattern.permute.xlu0 %v3107_v1  ;;  %v2949_v3 = vld [vmem:[%s3368_s30] ss:$24 sps:$4 sm:$0xff]  }
  0x24   : > { %577 = vperm.xlu0 %2921, %v498_v2   ;;  %2765 = vmatprep.subr.bf16.mxu1 %v2945_v45 }
  0x26   : > { %2766 = vmatpush3.bf16.msra.mxu1 %v2946_v49 }
  0x27   : > { %2906 = vset.pattern.permute.xlu1 %v3106_v0  ;;  %2767 = vmatprep.subr.bf16.mxu1 %v2947_v55 }
  0x28   : > { %680 = vperm.xlu1 %2906, %v495_v10   ;;  %567 = vperm.xlu0 %2921, %v496_v8  }
  0x2a   : > { %2768 = vmatpush3.bf16.msra.mxu1 %v2948_v58 }
  0x2c   : > { %2907 = vset.pattern.permute.xlu1 %v3107_v1  ;;  %562 = vperm.xlu0 %2921, %v495_v10  }
  0x2d   : > { %557 = vperm.xlu1 %2907, %v494_v11  }
  0x30   : > { %542 = vperm.xlu0 %2921, %v491_v12  }
  0x31   : > { %2908 = vset.pattern.permute.xlu1 %v3106_v0 }
  0x32   : > { %676 = vperm.xlu1 %2908, %v494_v11  }
  0x34   : > { %537 = vperm.xlu0 %2921, %v490_v13  }
  0x36   : > { %2909 = vset.pattern.permute.xlu1 %v3107_v1 }
  0x37   : > { %552 = vperm.xlu1 %2909, %v493_v4  }
  0x38   : > { %517 = vperm.xlu0 %2921, %v486_v14  }
  0x3b   : > { %2910 = vset.pattern.permute.xlu1 %v3108_v7 }
  0x3c   : > { %822 = vperm.xlu1 %2910, %v494_v11   ;;  %512 = vperm.xlu0 %2921, %v485_v15  }
  0x40   : > { %2911 = vset.pattern.permute.xlu1 %v3107_v1  ;;  %2925 = vset.pattern.permute.xlu0 %v3108_v7 }
  0x41   : > { %547 = vperm.xlu1 %2911, %v492_v5   ;;  %830 = vperm.xlu0 %2925, %v496_v8   ;;  %v2953_v8 = vld [vmem:[%s3988_s4 + $0x138] sm:$0xff]  }
  0x45   : > { %2912 = vset.pattern.permute.xlu1 %v3108_v7  ;;  %826 = vperm.xlu0 %2925, %v495_v10   ;;  %v3385_v10 = vrot.slane %v848_v60, %v843_v47 }
  0x46   : > { %818 = vperm.xlu1 %2912, %v493_v4  }
  0x49   : > { %810 = vperm.xlu0 %2925, %v491_v12  }
  0x4a   : > { %2913 = vset.pattern.permute.xlu1 %v3106_v0 }
  0x4b   : > { %664 = vperm.xlu1 %2913, %v491_v12  }
  0x4d   : > { %806 = vperm.xlu0 %2925, %v490_v13  }
  0x4f   : > { %2914 = vset.pattern.permute.xlu1 %v3108_v7 }
  0x50   : > { %814 = vperm.xlu1 %2914, %v492_v5   ;;  %v3374_v5 = vrot.slane %v844_v57, %v843_v47  ;;  %v2965_v57 = vld [vmem:[%s3988_s4 + $0x120] sm:$0xff]  }
  0x51   : > { %790 = vperm.xlu0 %2925, %v486_v14  }
  0x54   : > { %2915 = vset.pattern.permute.xlu1 %v3106_v0 }
  0x55   : > { %660 = vperm.xlu1 %2915, %v490_v13   ;;  %786 = vperm.xlu0 %2925, %v485_v15  }
  0x59   : > { %2916 = vset.pattern.permute.xlu1 %v3107_v1  ;;  %2930 = vset.pattern.permute.xlu0 %v3106_v0 }
  0x5a   : > { %532 = vperm.xlu1 %2916, %v489_v16   ;;  %632 = vperm.xlu0 %2930, %v3241_v17  }
  0x5e   : > { %2917 = vset.pattern.permute.xlu1 %v3106_v0  ;;  %2932 = vset.pattern.permute.xlu0 %v3108_v7 }
  0x5f   : > { %656 = vperm.xlu1 %2917, %v489_v16  }
  0x63   : > { %2918 = vset.pattern.permute.xlu1 %v3107_v1 }
  0x64   : > { %527 = vperm.xlu1 %2918, %v3210_v6  }
  0x68   : > { %2919 = vset.pattern.permute.xlu1 %v3108_v7 }
  0x69   : > { %802 = vperm.xlu1 %2919, %v489_v16  }
  0x6d   : > { %2920 = vset.pattern.permute.xlu1 %v3107_v1 }
  0x6e   : > { %522 = vperm.xlu1 %2920, %v3215_v9  }
  0x72   : > { %2922 = vset.pattern.permute.xlu1 %v3108_v7 }
  0x73   : > { %798 = vperm.xlu1 %2922, %v3210_v6   ;;  %v2951_v6 = vld [vmem:[%s3368_s30 + $0x4] ss:$24 sps:$4 sm:$0xff]  }
  0x74   : > { %1596 = vmatprep.mubr.bf16.mxu1 %v2951_v6 }
  0x75   : > { %1597 = vmatmul.mubr.bf16.vlgmr.msra.gmra.mxu1 %v2949_v3 }
  0x77   : > { %2923 = vset.pattern.permute.xlu1 %v3106_v0 }
  0x78   : > { %644 = vperm.xlu1 %2923, %v486_v14  }
  0x7c   : > { %2924 = vset.pattern.permute.xlu1 %v3108_v7 }
  0x7d   : > { %794 = vperm.xlu1 %2924, %v3215_v9  }
  0x81   : > { %2926 = vset.pattern.permute.xlu1 %v3106_v0 }
  0x82   : > { %640 = vperm.xlu1 %2926, %v485_v15  }
  0x86   : > { %2927 = vset.pattern.permute.xlu1 %v3107_v1 }
  0x87   : > { %507 = vperm.xlu1 %2927, %v484_v23  }
  0x8a   : > { %v3285_v28 = vpop.permute.xlu1 %572  ;;  %v3287_v29 = vpop.permute.xlu0 %692 }
  0x8b   : > { %2928 = vset.pattern.permute.xlu1 %v3106_v0  ;;  %v923_v0 = vld [vmem:[%s3987_s3] sm:$0x3]  ;;  %v627_v4 = vmul.f32 %v3348_v56, %v3285_v28  ;;  %v628_v9 = vmul.f32 %v3354_v59, %v3285_v28  ;;  %v743_v13 = vmul.f32 %v3337_v52, %v3287_v29  ;;  %v744_v14 = vmul.f32 %v3342_v54, %v3287_v29 }
  0x8c   : > { %636 = vperm.xlu1 %2928, %v484_v23   ;;  %v3388_v11 = vrot.slane %v923_v0, %v3300_v33  ;;  %v3391_v12 = vrot.slane %v923_v0, %v3312_v39 }
  0x8e   : > { %v3302_v34 = vpop.permute.xlu0 %672 }
  0x8f   : > { %v689_v36 = vpop.permute.xlu1 %688 }
  0x90   : > { %2929 = vset.pattern.permute.xlu1 %v3107_v1  ;;  %v741_v62 = vmul.f32 %v3337_v52, %v689_v36  ;;  %v742_v2 = vmul.f32 %v3342_v54, %v689_v36 }
  0x91   : > { %502 = vperm.xlu1 %2929, %v3241_v17  }
  0x92   : > { %v3321_v43 = vpop.permute.xlu0 %668  ;;  %v773_v15 = vadd.f32 %v741_v62, %v627_v4  ;;  %v2967_v62 = vld [vmem:[%s3988_s4 + $0x158] sm:$0xff]   ;;  %v2971_v4 = vld [vmem:[%s3988_s4 + $0x150] sm:$0xff]  }
  0x94   : > { %v3329_v48 = vpop.permute.xlu1 %838 }
  0x95   : > { %2931 = vset.pattern.permute.xlu1 %v3108_v7  ;;  %v2952_v7 = vld [vmem:[%s3988_s4 + $0x178] sm:$0xff]   ;;  %v889_v35 = vmul.f32 %v3374_v5, %v3329_v48  ;;  %v890_v36 = vmul.f32 %v3385_v10, %v3329_v48  ;;  %v2963_v48 = vld [vmem:[%s3988_s4 + $0x160] sm:$0xff]  }
  0x96   : > { %782 = vperm.xlu1 %2931, %v484_v23   ;;  %v3339_v53 = vpop.permute.xlu0 %652  ;;  %2809 = vmatprep.subr.bf16.mxu1 %v2952_v7  ;;  %v2973_v7 = vld [vmem:[%s3988_s4 + $0x110] sm:$0xff]  }
  0x97   : > { %2810 = vmatpush3.bf16.msra.mxu1 %v2953_v8  ;;  %v1119_v8 = vld [vmem:[%s3368_s30 + $0x30] sm:$0xff] }
  0x98   : > { %2811 = vmatprep.subr.bf16.mxu1 %v2955_v21 }
  0x99   : > { %v3356_v61 = vpop.permute.xlu1 %684 }
  0x9a   : > { %778 = vperm.xlu1 %2931, %v3241_v17   ;;  %v3360_v63 = vpop.permute.xlu0 %648  ;;  %v774_v17 = vadd.f32 %v742_v2, %v628_v9  ;;  %v2969_v2 = vld [vmem:[%s3988_s4 + $0x118] sm:$0xff]  }
  0x9b   : > { %2812 = vmatpush3.bf16.msra.mxu1 %v2957_v25 }
  0x9c   : > { %2813 = vmatprep.subr.bf16.mxu1 %v2959_v32  ;;  %v2983_v32 = vld [vmem:[%s3988_s4 + $0x100] sm:$0xff]  }
  0x9e   : > { %v835_v16 = vpop.permute.xlu1 %834 }
  0x9f   : > { %v887_v18 = vmul.f32 %v3374_v5, %v835_v16  ;;  %v888_v19 = vmul.f32 %v3385_v10, %v835_v16  ;;  %v578_v20 = vpop.permute.xlu0 %577  ;;  %2814 = vmatpush3.bf16.msra.mxu1 %v2961_v42  ;;  %v734_v42 = vmul.f32 %v3342_v54, %v3302_v34 }
  0xa0   : > { %v629_v22 = vmul.f32 %v3348_v56, %v578_v20  ;;  %v630_v23 = vmul.f32 %v3354_v59, %v578_v20  ;;  %2815 = vmatprep.subr.bf16.mxu1 %v2963_v48 }
  0xa1   : > { %v919_v27 = vadd.f32 %v887_v18, %v773_v15  ;;  %v920_v28 = vadd.f32 %v888_v19, %v774_v17  ;;  %v2977_v15 = vld [vmem:[%s3988_s4 + $0x148] sm:$0xff]  }
  0xa2   : > { %v775_v29 = vadd.f32 %v743_v13, %v629_v22  ;;  %v776_v30 = vadd.f32 %v744_v14, %v630_v23  ;;  %v2630_v13 = vcombine.high %v1119_v8, %v1119_v8  ;;  %v2629_v14 = vcombine.low %v1119_v8, %v1119_v8  ;;  %v2979_v19 = vld [vmem:[%s3988_s4 + $0x108] sm:$0xff]   ;;  %v2981_v22 = vld [vmem:[%s3988_s4 + $0x140] sm:$0xff]  }
  0xa3   : > { %v3416_v37 = vpop.permute.xlu1 %680  ;;  %v3418_v38 = vpop.permute.xlu0 %567  ;;  %v964_v40 = vadd.f32 %v3388_v11, %v920_v28  ;;  %v963_v41 = vadd.f32 %v3391_v12, %v919_v27  ;;  %2816 = vmatpush3.bf16.msra.mxu1 %v2965_v57 }
  0xa4   : > { %v922_v44 = vadd.f32 %v890_v36, %v776_v30  ;;  %v921_v45 = vadd.f32 %v889_v35, %v775_v29  ;;  %2817 = vmatprep.subr.bf16.mxu1 %v2967_v62  ;;  %1604 = vmatprep.mubr.bf16.mxu1 %v2630_v13  ;;  %v625_v35 = vmul.f32 %v3348_v56, %v3418_v38 }
  0xa5   : > { %v996_v46 = vmax.f32 %v964_v40, 0.0  ;;  %v995_v47 = vmax.f32 %v963_v41, 0.0  ;;  %1605 = vmatmul.mubr.bf16.gmra.mxu1 %v2629_v14  ;;  %v626_v36 = vmul.f32 %v3354_v59, %v3418_v38  ;;  %v2986_v40 = vld [vmem:[%s3368_s30 + $0x14] ss:$24 sps:$4 sm:$0xff]   ;;  %v733_v41 = vmul.f32 %v3337_v52, %v3302_v34 }
  0xa6   : > { %v966_v50 = vadd.f32 %v3388_v11, %v922_v44  ;;  %v965_v51 = vadd.f32 %v3391_v12, %v921_v45  ;;  %1692 = vmatprep.mubr.bf16.mxu1 %v2986_v40 }
  0xa7   : > { %v3433_v49 = vpop.permute.xlu0 %562  ;;  %1028 = vst [vmem:[%s3425_s29 + $0xe8] sm:$0xff] %v996_v46  ;;  %1027 = vst [vmem:[%s3425_s29 + $0xe0] sm:$0xff] %v995_v47  ;;  %2818 = vmatpush3.bf16.msra.mxu1 %v2969_v2 }
  0xa8   : > { %v558_v55 = vpop.permute.xlu1 %557  ;;  %v998_v58 = vmax.f32 %v966_v50, 0.0  ;;  %v997_v60 = vmax.f32 %v965_v51, 0.0  ;;  %2819 = vmatprep.subr.bf16.mxu1 %v2971_v4  ;;  %v623_v48 = vmul.f32 %v3348_v56, %v3433_v49  ;;  %v624_v38 = vmul.f32 %v3354_v59, %v3433_v49  ;;  %v2984_v50 = vld [vmem:[%s3368_s30 + $0x10] ss:$24 sps:$4 sm:$0xff]  }
  0xa9   : > { %v621_v20 = vmul.f32 %v3348_v56, %v558_v55  ;;  %v622_v21 = vmul.f32 %v3354_v59, %v558_v55  ;;  %v738_v4 = vmul.f32 %v3342_v54, %v3416_v37 }
  0xaa   : > { %1030 = vst [vmem:[%s3425_s29 + $0xf8] sm:$0xff] %v998_v58  ;;  %1042 = vmatprep.subr.mxu0 %v998_v58  ;;  %1029 = vst [vmem:[%s3425_s29 + $0xf0] sm:$0xff] %v997_v60 }
  0xab   : > { %v3447_v0 = vpop.permute.xlu0 %542  ;;  %1043 = vmatpush1.msra.mxu0 %v997_v60  ;;  %2820 = vmatpush3.bf16.msra.mxu1 %v2973_v7 }
  0xac   : > { %1044 = vmatprep.subr.mxu0 %v996_v46  ;;  %2821 = vmatprep.subr.bf16.mxu1 %v2977_v15  ;;  %v739_v46 = vmul.f32 %v3337_v52, %v3356_v61  ;;  %v770_v15 = vadd.f32 %v738_v4, %v624_v38  ;;  %v616_v38 = vmul.f32 %v3354_v59, %v3447_v0 }
  0xad   : > { %v677_v3 = vpop.permute.xlu1 %676  ;;  %1045 = vmatpush1.msra.mxu0 %v995_v47  ;;  %v740_v47 = vmul.f32 %v3342_v54, %v3356_v61 }
  0xae   : > { %v735_v17 = vmul.f32 %v3337_v52, %v677_v3  ;;  %v736_v18 = vmul.f32 %v3342_v54, %v677_v3  ;;  %v771_v61 = vadd.f32 %v739_v46, %v625_v35  ;;  %v737_v3 = vmul.f32 %v3337_v52, %v3416_v37 }
  0xaf   : > { %v3455_v6 = vpop.permute.xlu0 %537  ;;  %2822 = vmatpush3.bf16.msra.mxu1 %v2979_v19  ;;  %v772_v62 = vadd.f32 %v740_v47, %v626_v36 }
  0xb0   : > { %v767_v27 = vadd.f32 %v735_v17, %v621_v20  ;;  %v768_v28 = vadd.f32 %v736_v18, %v622_v21  ;;  %2823 = vmatprep.subr.bf16.mxu1 %v2981_v22  ;;  %v769_v14 = vadd.f32 %v737_v3, %v623_v48  ;;  %v1121_v20 = vld [vmem:[%s3368_s30 + $0x40] sm:$0xff]  ;;  %v615_v48 = vmul.f32 %v3348_v56, %v3447_v0 }
  0xb2   : > { %v553_v9 = vpop.permute.xlu1 %552 }
  0xb3   : > { %v3464_v16 = vpop.permute.xlu0 %517  ;;  %v619_v51 = vmul.f32 %v3348_v56, %v553_v9  ;;  %v620_v34 = vmul.f32 %v3354_v59, %v553_v9  ;;  %2824 = vmatpush3.bf16.msra.mxu1 %v2983_v32  ;;  %v2633_v32 = vcombine.low %v1121_v20, %v1121_v20 }
  0xb5   : > { %v765_v17 = vadd.f32 %v733_v41, %v619_v51  ;;  %v766_v18 = vadd.f32 %v734_v42, %v620_v34  ;;  %v731_v42 = vmul.f32 %v3337_v52, %v3321_v43 }
  0xb6   : > { %1693 = vmatmul.mubr.bf16.vlgmr.msra.gmra.mxu1 %v2984_v50 }
  0xb7   : > { %v823_v23 = vpop.permute.xlu1 %822  ;;  %v3476_v25 = vpop.permute.xlu0 %512 }
  0xb8   : > { %v881_v29 = vmul.f32 %v3374_v5, %v823_v23  ;;  %v882_v30 = vmul.f32 %v3385_v10, %v823_v23 }
  0xba   : > { %v913_v44 = vadd.f32 %v881_v29, %v767_v27  ;;  %v914_v45 = vadd.f32 %v882_v30, %v768_v28  ;;  %v2634_v30 = vcombine.high %v1121_v20, %v1121_v20 }
  0xbc   : > { %v548_v55 = vpop.permute.xlu1 %547  ;;  %v831_v57 = vpop.permute.xlu0 %830  ;;  %v3504_v58 = vadd.f32 %v3388_v11, %v914_v45  ;;  %v3507_v60 = vadd.f32 %v3391_v12, %v913_v44  ;;  %v732_v44 = vmul.f32 %v3342_v54, %v3321_v43  ;;  %1700 = vmatprep.mubr.bf16.mxu1 %v2634_v30  ;;  %v614_v30 = vmul.f32 %v3354_v59, %v3455_v6 }
  0xbd   : > { %v885_v49 = vmul.f32 %v3374_v5, %v831_v57  ;;  %v886_v2 = vmul.f32 %v3385_v10, %v831_v57  ;;  %v617_v4 = vmul.f32 %v3348_v56, %v548_v55 }
  0xbe   : > { %v990_v7 = vmax.f32 %v3504_v58, 0.0  ;;  %v989_v8 = vmax.f32 %v3507_v60, 0.0  ;;  %1701 = vmatmul.mubr.bf16.gmra.mxu1 %v2633_v32 }
  0xbf   : > { %v917_v9 = vadd.f32 %v885_v49, %v771_v61  ;;  %v918_v13 = vadd.f32 %v886_v2, %v772_v62 }
  0xc0   : > { %v827_v19 = vpop.permute.xlu0 %826  ;;  %1022 = vst [vmem:[%s3425_s29 + $0xb8] sm:$0xff] %v990_v7  ;;  %1021 = vst [vmem:[%s3425_s29 + $0xb0] sm:$0xff] %v989_v8 }
  0xc1   : > { %v883_v37 = vmul.f32 %v3374_v5, %v827_v19  ;;  %v884_v21 = vmul.f32 %v3385_v10, %v827_v19  ;;  %v819_v22 = vpop.permute.xlu1 %818  ;;  %v962_v23 = vadd.f32 %v3388_v11, %v918_v13  ;;  %v961_v27 = vadd.f32 %v3391_v12, %v917_v9 }
  0xc2   : > { %v879_v28 = vmul.f32 %v3374_v5, %v819_v22  ;;  %v880_v29 = vmul.f32 %v3385_v10, %v819_v22  ;;  %v618_v9 = vmul.f32 %v3354_v59, %v548_v55 }
  0xc3   : > { %v915_v35 = vadd.f32 %v883_v37, %v769_v14  ;;  %v916_v36 = vadd.f32 %v884_v21, %v770_v15  ;;  %v994_v40 = vmax.f32 %v962_v23, 0.0  ;;  %v993_v41 = vmax.f32 %v961_v27, 0.0 }
  0xc4   : > { %v911_v45 = vadd.f32 %v879_v28, %v765_v17  ;;  %v912_v46 = vadd.f32 %v880_v29, %v766_v18  ;;  %v811_v47 = vpop.permute.xlu0 %810  ;;  %v763_v37 = vadd.f32 %v731_v42, %v617_v4  ;;  %v764_v21 = vadd.f32 %v732_v44, %v618_v9 }
  0xc5   : > { %1026 = vst [vmem:[%s3425_s29 + $0xd8] sm:$0xff] %v994_v40  ;;  %1046 = vmatprep.subr.mxu0 %v994_v40  ;;  %1025 = vst [vmem:[%s3425_s29 + $0xd0] sm:$0xff] %v993_v41  ;;  %v960_v50 = vadd.f32 %v3388_v11, %v916_v36  ;;  %v959_v51 = vadd.f32 %v3391_v12, %v915_v35  ;;  %v875_v43 = vmul.f32 %v3374_v5, %v811_v47 }
  0xc6   : > { %v665_v34 = vpop.permute.xlu1 %664  ;;  %1047 = vmatpush1.msra.mxu0 %v993_v41  ;;  %v876_v57 = vmul.f32 %v3385_v10, %v811_v47  ;;  %v956_v61 = vadd.f32 %v3388_v11, %v912_v46  ;;  %v955_v62 = vadd.f32 %v3391_v12, %v911_v45 }
  0xc7   : > { %v729_v0 = vmul.f32 %v3337_v52, %v665_v34  ;;  %v730_v49 = vmul.f32 %v3342_v54, %v665_v34  ;;  %v992_v2 = vmax.f32 %v960_v50, 0.0  ;;  %v991_v3 = vmax.f32 %v959_v51, 0.0 }
  0xc8   : > { %v988_v13 = vmax.f32 %v956_v61, 0.0  ;;  %v987_v14 = vmax.f32 %v955_v62, 0.0  ;;  %v807_v58 = vpop.permute.xlu0 %806 }
  0xc9   : > { %v761_v15 = vadd.f32 %v729_v0, %v615_v48  ;;  %v762_v17 = vadd.f32 %v730_v49, %v616_v38  ;;  %1024 = vst [vmem:[%s3425_s29 + $0xc8] sm:$0xff] %v992_v2  ;;  %1048 = vmatprep.subr.mxu0 %v992_v2  ;;  %1023 = vst [vmem:[%s3425_s29 + $0xc0] sm:$0xff] %v991_v3  ;;  %v873_v42 = vmul.f32 %v3374_v5, %v807_v58 }
  0xca   : > { %1049 = vmatpush1.msra.mxu0 %v991_v3  ;;  %1020 = vst [vmem:[%s3425_s29 + $0xa8] sm:$0xff] %v988_v13  ;;  %1019 = vst [vmem:[%s3425_s29 + $0xa0] sm:$0xff] %v987_v14  ;;  %v874_v44 = vmul.f32 %v3385_v10, %v807_v58 }
  0xcb   : > { %v907_v18 = vadd.f32 %v875_v43, %v761_v15  ;;  %v908_v19 = vadd.f32 %v876_v57, %v762_v17  ;;  %v815_v20 = vpop.permute.xlu1 %814  ;;  %1050 = vmatprep.subr.mxu0 %v990_v7  ;;  %v613_v7 = vmul.f32 %v3348_v56, %v3455_v6 }
  0xcc   : > { %v877_v55 = vmul.f32 %v3374_v5, %v815_v20  ;;  %v878_v22 = vmul.f32 %v3385_v10, %v815_v20  ;;  %1051 = vmatpush1.msra.mxu0 %v989_v8 }
  0xcd   : > { %1052 = vmatprep.subr.mxu0 %v988_v13  ;;  %v952_v23 = vadd.f32 %v3388_v11, %v908_v19  ;;  %v951_v27 = vadd.f32 %v3391_v12, %v907_v18 }
  0xce   : > { %v909_v28 = vadd.f32 %v877_v55, %v763_v37  ;;  %v910_v29 = vadd.f32 %v878_v22, %v764_v21  ;;  %1053 = vmatpush1.msra.mxu0 %v987_v14 }
  0xcf   : > { %v984_v60 = vmax.f32 %v952_v23, 0.0  ;;  %v983_v8 = vmax.f32 %v951_v27, 0.0  ;;  %v723_v27 = vmul.f32 %v3337_v52, %v3339_v53 }
  0xd0   : > { %v661_v32 = vpop.permute.xlu1 %660  ;;  %v954_v35 = vadd.f32 %v3388_v11, %v910_v29  ;;  %v953_v36 = vadd.f32 %v3391_v12, %v909_v28  ;;  %v724_v28 = vmul.f32 %v3342_v54, %v3339_v53  ;;  %v606_v53 = vmul.f32 %v3354_v59, %v3464_v16 }
  0xd1   : > { %v727_v40 = vmul.f32 %v3337_v52, %v661_v32  ;;  %v728_v41 = vmul.f32 %v3342_v54, %v661_v32  ;;  %1016 = vst [vmem:[%s3425_s29 + $0x88] sm:$0xff] %v984_v60  ;;  %1015 = vst [vmem:[%s3425_s29 + $0x80] sm:$0xff] %v983_v8 }
  0xd2   : > { %v986_v6 = vmax.f32 %v954_v35, 0.0  ;;  %v985_v45 = vmax.f32 %v953_v36, 0.0  ;;  %v791_v35 = vpop.permute.xlu0 %790  ;;  %v605_v36 = vmul.f32 %v3348_v56, %v3464_v16 }
  0xd3   : > { %v759_v46 = vadd.f32 %v727_v40, %v613_v7  ;;  %v760_v47 = vadd.f32 %v728_v41, %v614_v30 }
  0xd4   : > { %1018 = vst [vmem:[%s3425_s29 + $0x98] sm:$0xff] %v986_v6  ;;  %1054 = vmatprep.subr.mxu0 %v986_v6  ;;  %1017 = vst [vmem:[%s3425_s29 + $0x90] sm:$0xff] %v985_v45 }
  0xd5   : > { %v905_v48 = vadd.f32 %v873_v42, %v759_v46  ;;  %v906_v38 = vadd.f32 %v874_v44, %v760_v47  ;;  %v533_v50 = vpop.permute.xlu1 %532  ;;  %1055 = vmatpush1.msra.mxu0 %v985_v45  ;;  %v865_v45 = vmul.f32 %v3374_v5, %v791_v35  ;;  %v866_v46 = vmul.f32 %v3385_v10, %v791_v35 }
  0xd6   : > { %1056 = vmatprep.subr.mxu0 %v984_v60  ;;  %v611_v2 = vmul.f32 %v3348_v56, %v533_v50  ;;  %v612_v3 = vmul.f32 %v3354_v59, %v533_v50 }
  0xd7   : > { %1057 = vmatpush1.msra.mxu0 %v983_v8  ;;  %v950_v51 = vadd.f32 %v3388_v11, %v906_v38  ;;  %v949_v34 = vadd.f32 %v3391_v12, %v905_v48 }
  0xd9   : > { %v982_v43 = vmax.f32 %v950_v51, 0.0  ;;  %v981_v57 = vmax.f32 %v949_v34, 0.0  ;;  %v721_v34 = vmul.f32 %v3337_v52, %v3360_v63 }
  0xda   : > { %v657_v61 = vpop.permute.xlu1 %656 }
  0xdb   : > { %1014 = vst [vmem:[%s3425_s29 + $0x78] sm:$0xff] %v982_v43  ;;  %1058 = vmatprep.subr.mxu0 %v982_v43  ;;  %1013 = vst [vmem:[%s3425_s29 + $0x70] sm:$0xff] %v981_v57  ;;  %v725_v0 = vmul.f32 %v3337_v52, %v657_v61  ;;  %v726_v49 = vmul.f32 %v3342_v54, %v657_v61  ;;  %v722_v43 = vmul.f32 %v3342_v54, %v3360_v63 }
  0xdc   : > { %1059 = vmatpush1.msra.mxu0 %v981_v57 }
  0xdd   : > { %v757_v9 = vadd.f32 %v725_v0, %v611_v2  ;;  %v758_v13 = vadd.f32 %v726_v49, %v612_v3 }
  0xdf   : > { %v528_v62 = vpop.permute.xlu1 %527 }
  0xe0   : > { %v609_v21 = vmul.f32 %v3348_v56, %v528_v62  ;;  %v610_v55 = vmul.f32 %v3354_v59, %v528_v62 }
  0xe2   : > { %v755_v58 = vadd.f32 %v723_v27, %v609_v21  ;;  %v756_v7 = vadd.f32 %v724_v28, %v610_v55  ;;  %v604_v21 = vmul.f32 %v3354_v59, %v3476_v25 }
  0xe4   : > { %v803_v4 = vpop.permute.xlu1 %802 }
  0xe5   : > { %v871_v14 = vmul.f32 %v3374_v5, %v803_v4  ;;  %v872_v15 = vmul.f32 %v3385_v10, %v803_v4 }
  0xe7   : > { %v903_v17 = vadd.f32 %v871_v14, %v757_v9  ;;  %v904_v18 = vadd.f32 %v872_v15, %v758_v13 }
  0xe9   : > { %v523_v19 = vpop.permute.xlu1 %522  ;;  %v948_v20 = vadd.f32 %v3388_v11, %v904_v18  ;;  %v947_v37 = vadd.f32 %v3391_v12, %v903_v17  ;;  %v787_v17 = vpop.permute.xlu0 %786 }
  0xea   : > { %v607_v47 = vmul.f32 %v3348_v56, %v523_v19  ;;  %v608_v48 = vmul.f32 %v3354_v59, %v523_v19  ;;  %v863_v28 = vmul.f32 %v3374_v5, %v787_v17 }
  0xeb   : > { %v980_v22 = vmax.f32 %v948_v20, 0.0  ;;  %v979_v23 = vmax.f32 %v947_v37, 0.0  ;;  %v603_v37 = vmul.f32 %v3348_v56, %v3476_v25 }
  0xec   : > { %v753_v0 = vadd.f32 %v721_v34, %v607_v47  ;;  %v754_v49 = vadd.f32 %v722_v43, %v608_v48 }
  0xed   : > { %1012 = vst [vmem:[%s3425_s29 + $0x68] sm:$0xff] %v980_v22  ;;  %1060 = vmatprep.subr.mxu0 %v980_v22  ;;  %1011 = vst [vmem:[%s3425_s29 + $0x60] sm:$0xff] %v979_v23 }
  0xee   : > { %v799_v29 = vpop.permute.xlu1 %798  ;;  %1061 = vmatpush1.msra.mxu0 %v979_v23 }
  0xef   : > { %v869_v30 = vmul.f32 %v3374_v5, %v799_v29  ;;  %v870_v60 = vmul.f32 %v3385_v10, %v799_v29  ;;  %v864_v29 = vmul.f32 %v3385_v10, %v787_v17 }
  0xf1   : > { %v901_v8 = vadd.f32 %v869_v30, %v755_v58  ;;  %v902_v32 = vadd.f32 %v870_v60, %v756_v7 }
  0xf3   : > { %v645_v40 = vpop.permute.xlu1 %644  ;;  %v946_v41 = vadd.f32 %v3388_v11, %v902_v32  ;;  %v945_v42 = vadd.f32 %v3391_v12, %v901_v8 }
  0xf4   : > { %v719_v44 = vmul.f32 %v3337_v52, %v645_v40  ;;  %v720_v6 = vmul.f32 %v3342_v54, %v645_v40 }
  0xf5   : > { %v978_v16 = vmax.f32 %v946_v41, 0.0  ;;  %v977_v38 = vmax.f32 %v945_v42, 0.0 }
  0xf6   : > { %v751_v50 = vadd.f32 %v719_v44, %v605_v36  ;;  %v752_v51 = vadd.f32 %v720_v6, %v606_v53  ;;  %v633_v44 = vpop.permute.xlu0 %632 }
  0xf7   : > { %1010 = vst [vmem:[%s3425_s29 + $0x58] sm:$0xff] %v978_v16  ;;  %1062 = vmatprep.subr.mxu0 %v978_v16  ;;  %1009 = vst [vmem:[%s3425_s29 + $0x50] sm:$0xff] %v977_v38  ;;  %v713_v47 = vmul.f32 %v3337_v52, %v633_v44  ;;  %v714_v48 = vmul.f32 %v3342_v54, %v633_v44  ;;  %v3004_v44 = vld [vmem:[%s3992_s8 + $0x54] ss:$8 sps:$4 sm:$0xff]  }
  0xf8   : > { %v897_v57 = vadd.f32 %v865_v45, %v751_v50  ;;  %v898_v61 = vadd.f32 %v866_v46, %v752_v51  ;;  %v795_v62 = vpop.permute.xlu1 %794  ;;  %1063 = vmatpush1.msra.mxu0 %v977_v38  ;;  %v3643_v46 = vadd.s32 1, %v3294_v31 }
  0xf9   : > { %v867_v2 = vmul.f32 %v3374_v5, %v795_v62  ;;  %v868_v3 = vmul.f32 %v3385_v10, %v795_v62 }
  0xfa   : > { %v942_v4 = vadd.f32 %v3388_v11, %v898_v61  ;;  %v941_v9 = vadd.f32 %v3391_v12, %v897_v57 }
  0xfb   : > { %v899_v63 = vadd.f32 %v867_v2, %v753_v0  ;;  %v900_v13 = vadd.f32 %v868_v3, %v754_v49  ;;  %v3652_v0 = vand.u32 127, %v581_v26 }
  0xfc   : > { %v974_v14 = vmax.f32 %v942_v4, 0.0  ;;  %v973_v15 = vmax.f32 %v941_v9, 0.0 }
  0xfd   : > { %v641_v18 = vpop.permute.xlu1 %640  ;;  %v944_v19 = vadd.f32 %v3388_v11, %v900_v13  ;;  %v943_v20 = vadd.f32 %v3391_v12, %v899_v63 }
  0xfe   : > { %v717_v55 = vmul.f32 %v3337_v52, %v641_v18  ;;  %v718_v22 = vmul.f32 %v3342_v54, %v641_v18  ;;  %1006 = vst [vmem:[%s3425_s29 + $0x38] sm:$0xff] %v974_v14  ;;  %1005 = vst [vmem:[%s3425_s29 + $0x30] sm:$0xff] %v973_v15 }
  0xff   : > { %v976_v23 = vmax.f32 %v944_v19, 0.0  ;;  %v975_v27 = vmax.f32 %v943_v20, 0.0  ;;  %v2954_v19 = vld [vmem:[%s3988_s4 + $0xf8] sm:$0xff]   ;;  %v2958_v20 = vld [vmem:[%s3988_s4 + $0xf0] sm:$0xff]  }
 0x100   : > { %v749_v58 = vadd.f32 %v717_v55, %v603_v37  ;;  %v750_v7 = vadd.f32 %v718_v22, %v604_v21  ;;  %v3110_v37 = vmov 0.0625   ;;  %v2960_v21 = vld [vmem:[%s3988_s4 + $0xb0] sm:$0xff]   ;;  %v2962_v55 = vld [vmem:[%s3988_s4 + $0xe8] sm:$0xff]  }
 0x101   : > { %1008 = vst [vmem:[%s3425_s29 + $0x48] sm:$0xff] %v976_v23  ;;  %1064 = vmatprep.subr.mxu0 %v976_v23  ;;  %1007 = vst [vmem:[%s3425_s29 + $0x40] sm:$0xff] %v975_v27  ;;  %v2964_v22 = vld [vmem:[%s3988_s4 + $0xa8] sm:$0xff]   ;;  %v2966_v23 = vld [vmem:[%s3988_s4 + $0xe0] sm:$0xff]  }
 0x102   : > { %v895_v25 = vadd.f32 %v863_v28, %v749_v58  ;;  %v896_v30 = vadd.f32 %v864_v29, %v750_v7  ;;  %1065 = vmatpush1.msra.mxu0 %v975_v27  ;;  %v508_v60 = vpop.permute.xlu1 %507  ;;  %v2968_v27 = vld [vmem:[%s3988_s4 + $0xa0] sm:$0xff]   ;;  %v2970_v28 = vld [vmem:[%s3988_s4 + $0xd8] sm:$0xff]   ;;  %v2976_v58 = vld [vmem:[%s3988_s4 + $0xd0] sm:$0xff]  }
 0x103   : > { %1066 = vmatprep.subr.mxu0 %v974_v14  ;;  %v601_v6 = vmul.f32 %v3348_v56, %v508_v60  ;;  %v602_v45 = vmul.f32 %v3354_v59, %v508_v60  ;;  %v2972_v29 = vld [vmem:[%s3988_s4 + $0x98] sm:$0xff]   ;;  %v2978_v7 = vld [vmem:[%s3988_s4 + $0x90] sm:$0xff]   ;;  %v2987_v60 = vld [vmem:[%s3988_s4 + $0xc0] sm:$0xff]  }
 0x104   : > { %1067 = vmatpush1.msra.mxu0 %v973_v15  ;;  %v940_v8 = vadd.f32 %v3388_v11, %v896_v30  ;;  %v939_v32 = vadd.f32 %v3391_v12, %v895_v25  ;;  %v2980_v25 = vld [vmem:[%s3988_s4 + $0xc8] sm:$0xff]  }
 0x105   : > { %v2982_v30 = vld [vmem:[%s3988_s4 + $0x88] sm:$0xff]  }
 0x106   : > { %v972_v35 = vmax.f32 %v940_v8, 0.0  ;;  %v971_v36 = vmax.f32 %v939_v32, 0.0  ;;  %v2988_v8 = vld [vmem:[%s3988_s4 + $0x80] sm:$0xff]   ;;  %v1120_v32 = vld [vmem:[%s3368_s30 + $0x38] sm:$0xff] }
 0x107   : > { %v637_v53 = vpop.permute.xlu1 %636 }
 0x108   : > { %1004 = vst [vmem:[%s3425_s29 + $0x28] sm:$0xff] %v972_v35  ;;  %1068 = vmatprep.subr.mxu0 %v972_v35  ;;  %1003 = vst [vmem:[%s3425_s29 + $0x20] sm:$0xff] %v971_v36  ;;  %v715_v41 = vmul.f32 %v3337_v52, %v637_v53  ;;  %v716_v42 = vmul.f32 %v3342_v54, %v637_v53  ;;  %v2998_v35 = vld [vmem:[%s3992_s8 + $0x74] ss:$8 sps:$4 sm:$0xff]   ;;  %v2632_v53 = vcombine.high %v1120_v32, %v1120_v32 }
 0x109   : > { %1069 = vmatpush1.msra.mxu0 %v971_v36  ;;  %v2989_v36 = vld [vmem:[%s3368_s30 + $0x8] ss:$24 sps:$4 sm:$0xff]  }
 0x10a   : > { %v747_v51 = vadd.f32 %v715_v41, %v601_v6  ;;  %v748_v34 = vadd.f32 %v716_v42, %v602_v45  ;;  %v3001_v41 = vld [vmem:[%s3992_s8 + $0x64] ss:$8 sps:$4 sm:$0xff]   ;;  %v2999_v42 = vld [vmem:[%s3992_s8 + $0x60] ss:$8 sps:$4 sm:$0xff]   ;;  %v2631_v6 = vcombine.low %v1120_v32, %v1120_v32  ;;  %v3002_v45 = vld [vmem:[%s3992_s8 + $0x50] ss:$8 sps:$4 sm:$0xff]  }
 0x10b   : > { %v3044_v32 = vld [vmem:[%s3990_s6 + $0x8] sm:$0xff]  }
 0x10c   : > { %v503_v40 = vpop.permute.xlu1 %502  ;;  %2867 = vmatprep.subr.bf16.mxu1 %v3044_v32 }
 0x10d   : > { %v599_v16 = vmul.f32 %v3348_v56, %v503_v40  ;;  %v600_v38 = vmul.f32 %v3354_v59, %v503_v40  ;;  %v1035_v56 = vmul.u32 16, %v3294_v31  ;;  %v1038_v59 = vmul.u32 16, %v3643_v46  ;;  %v2996_v40 = vld [vmem:[%s3992_s8 + $0x70] ss:$8 sps:$4 sm:$0xff]   ;;  %2868 = vmatpush3.bf16.msra.mxu1 %v3044_v32 }
 0x10f   : > { %v745_v52 = vadd.f32 %v713_v47, %v599_v16  ;;  %v746_v54 = vadd.f32 %v714_v48, %v600_v38  ;;  %vm3665_vm0 = vcmp.ge.s32.totalorder %v3652_v0, %v1035_v56  ;;  %vm1039_vm1 = vcmp.lt.s32.totalorder %v3652_v0, %v1038_v59  ;;  %v3007_v47 = vld [vmem:[%s3992_s8 + $0x44] ss:$8 sps:$4 sm:$0xff]   ;;  %v3005_v48 = vld [vmem:[%s3992_s8 + $0x40] ss:$8 sps:$4 sm:$0xff]   ;;  %v3010_v16 = vld [vmem:[%s3992_s8 + $0x34] ss:$8 sps:$4 sm:$0xff]  }
 0x110   : > { %vm1040_vm2 = vmand %vm3665_vm0, %vm1039_vm1  ;;  %v3008_v38 = vld [vmem:[%s3992_s8 + $0x30] ss:$8 sps:$4 sm:$0xff]   ;;  %v3023_v56 = vld [vmem:[%s3992_s8 + $0xe0] ss:$8 sps:$4 sm:$0xff]  }
 0x111   : > { %v783_v50 = vpop.permute.xlu1 %782 }
 0x112   : > { %v861_v43 = vmul.f32 %v3374_v5, %v783_v50  ;;  %v862_v57 = vmul.f32 %v3385_v10, %v783_v50  ;;  %v3013_v50 = vld [vmem:[%s3992_s8 + $0x24] ss:$8 sps:$4 sm:$0xff]  }
 0x114   : > { %v893_v61 = vadd.f32 %v861_v43, %v747_v51  ;;  %v894_v62 = vadd.f32 %v862_v57, %v748_v34  ;;  %v3011_v51 = vld [vmem:[%s3992_s8 + $0x20] ss:$8 sps:$4 sm:$0xff]   ;;  %v3016_v34 = vld [vmem:[%s3992_s8 + $0x14] ss:$8 sps:$4 sm:$0xff]   ;;  %v3014_v43 = vld [vmem:[%s3992_s8 + $0x10] ss:$8 sps:$4 sm:$0xff]  }
 0x115   : > { %v779_v49 = vpop.permute.xlu1 %778  ;;  %v3019_v57 = vld [vmem:[%s3992_s8 + $0x4] ss:$8 sps:$4 sm:$0xff]  }
 0x116   : > { %v859_v2 = vmul.f32 %v3374_v5, %v779_v49  ;;  %v860_v3 = vmul.f32 %v3385_v10, %v779_v49  ;;  %v938_v4 = vadd.f32 %v3388_v11, %v894_v62  ;;  %v937_v9 = vadd.f32 %v3391_v12, %v893_v61  ;;  %v3017_v61 = vld [vmem:[%s3992_s8] ss:$8 sps:$4 sm:$0xff]   ;;  %v3022_v62 = vld [vmem:[%s3992_s8 + $0xf4] ss:$8 sps:$4 sm:$0xff]   ;;  %v3037_v10 = vld [vmem:[%s3992_s8 + $0xa4] ss:$8 sps:$4 sm:$0xff]  }
 0x118   : > { %v891_v63 = vadd.f32 %v859_v2, %v745_v52  ;;  %v892_v13 = vadd.f32 %v860_v3, %v746_v54  ;;  %v970_v26 = vmax.f32 %v938_v4, 0.0  ;;  %v969_v14 = vmax.f32 %v937_v9, 0.0  ;;  %v3020_v52 = vld [vmem:[%s3992_s8 + $0xf0] ss:$8 sps:$4 sm:$0xff]   ;;  %v3025_v54 = vld [vmem:[%s3992_s8 + $0xe4] ss:$8 sps:$4 sm:$0xff]  }
 0x119   : > { %v3028_v2 = vld [vmem:[%s3992_s8 + $0xd4] ss:$8 sps:$4 sm:$0xff]   ;;  %v3026_v9 = vld [vmem:[%s3992_s8 + $0xd0] ss:$8 sps:$4 sm:$0xff]  }
 0x11a   : > { %1002 = vst [vmem:[%s3425_s29 + $0x18] sm:$0xff] %v970_v26  ;;  %1070 = vmatprep.subr.mxu0 %v970_v26  ;;  %1001 = vst [vmem:[%s3425_s29 + $0x10] sm:$0xff] %v969_v14  ;;  %v936_v15 = vadd.f32 %v3388_v11, %v892_v13  ;;  %v935_v5 = vadd.f32 %v3391_v12, %v891_v63  ;;  %v2956_v11 = vld [vmem:[%s3988_s4 + $0xb8] sm:$0xff]   ;;  %v2991_v12 = vld [vmem:[%s3368_s30 + $0xc] ss:$24 sps:$4 sm:$0xff]  }
 0x11b   : > { %1071 = vmatpush1.msra.mxu0 %v969_v14  ;;  %v3031_v13 = vld [vmem:[%s3992_s8 + $0xc4] ss:$8 sps:$4 sm:$0xff]   ;;  %v3029_v14 = vld [vmem:[%s3992_s8 + $0xc0] ss:$8 sps:$4 sm:$0xff]  }
 0x11c   : > { %v968_v17 = vmax.f32 %v936_v15, 0.0  ;;  %v967_v18 = vmax.f32 %v935_v5, 0.0  ;;  %v3034_v15 = vld [vmem:[%s3992_s8 + $0xb4] ss:$8 sps:$4 sm:$0xff]   ;;  %v3032_v5 = vld [vmem:[%s3992_s8 + $0xb0] ss:$8 sps:$4 sm:$0xff]  }
 0x11e   : > { %1000 = vst [vmem:[%s3425_s29 + $0x8] sm:$0xff] %v968_v17  ;;  %1072 = vmatprep.subr.mxu0 %v968_v17  ;;  %999 = vst [vmem:[%s3425_s29] sm:$0xff] %v967_v18  ;;  %v3035_v17 = vld [vmem:[%s3992_s8 + $0xa0] ss:$8 sps:$4 sm:$0xff]  }
 0x11f   : > { %1073 = vmatpush1.msra.mxu0 %v967_v18  ;;  %v3040_v18 = vld [vmem:[%s3992_s8 + $0x94] ss:$8 sps:$4 sm:$0xff]  }
 0x120   : > { %2621 = vmatmul.mubr.msk.f32.vlgmr.msra.gmra.mxu0 %vm1040_vm2, %v3110_v37  ;;  %2781 = vmatprep.subr.bf16.mxu0 %v2954_v19  ;;  %v3038_v19 = vld [vmem:[%s3992_s8 + $0x90] ss:$8 sps:$4 sm:$0xff]  }
 0x121   : > { %2782 = vmatpush3.bf16.msra.mxu0 %v2956_v11  ;;  %1644 = vmatprep.mubr.bf16.mxu0 %v2991_v12  ;;  %v3043_v12 = vld [vmem:[%s3992_s8 + $0x84] ss:$8 sps:$4 sm:$0xff]  }
 0x122   : > { %2783 = vmatprep.subr.bf16.mxu0 %v2958_v20 }
 0x125   : > { %2784 = vmatpush3.bf16.msra.mxu0 %v2960_v21  ;;  %v3041_v21 = vld [vmem:[%s3992_s8 + $0x80] ss:$8 sps:$4 sm:$0xff]  }
 0x126   : > { %2785 = vmatprep.subr.bf16.mxu0 %v2962_v55 }
 0x129   : > { %2786 = vmatpush3.bf16.msra.mxu0 %v2964_v22 }
 0x12a   : > { %2787 = vmatprep.subr.bf16.mxu0 %v2966_v23 }
 0x12d   : > { %2788 = vmatpush3.bf16.msra.mxu0 %v2968_v27 }
 0x12e   : > { %2789 = vmatprep.subr.bf16.mxu0 %v2970_v28 }
 0x131   : > { %2790 = vmatpush3.bf16.msra.mxu0 %v2972_v29 }
 0x132   : > { %2791 = vmatprep.subr.bf16.mxu0 %v2976_v58 }
 0x135   : > { %2792 = vmatpush3.bf16.msra.mxu0 %v2978_v7  ;;  %v2769_v49 = vpop.f32.mrf.mxu1 }
 0x136   : > { %2793 = vmatprep.subr.bf16.mxu0 %v2980_v25 }
 0x137   : > { %v2770_v59 = vpop.f32.mrf.mxu1 }
 0x138   : > { %v2771_v3 = vadd.f32 %v2770_v59, %v2769_v49 }
 0x139   : > { %2794 = vmatpush3.bf16.msra.mxu0 %v2982_v30  ;;  %v2772_v4 = vpop.f32.mrf.mxu1 }
 0x13a   : > { %2795 = vmatprep.subr.bf16.mxu0 %v2987_v60 }
 0x13b   : > { %v2773_v63 = vpop.f32.mrf.mxu1 }
 0x13c   : > { %v2774_v26 = vadd.f32 %v2773_v63, %v2772_v4 }
 0x13d   : > { %2796 = vmatpush3.bf16.msra.mxu0 %v2988_v8 }
 0x13e   : > { %2246 = vmatprep.subr.bf16.mxu0 %v2998_v35 }
 0x140   : > { %1645 = vmatmul.mubr.bf16.vlgmr.msra.gmra.mxu0 %v2989_v36  ;;  %v3045_v36 = vld [vmem:[%s3990_s6] sm:$0xff]  }
 0x141   : > { %1652 = vmatprep.mubr.bf16.mxu0 %v2632_v53  ;;  %2247 = vmatpush1.bf16.msra.mxu0 %v2996_v40 }
 0x142   : > { %2248 = vmatprep.subr.bf16.mxu0 %v3001_v41  ;;  %2869 = vmatprep.subr.bf16.mxu1 %v3045_v36 }
 0x143   : > { %2870 = vmatpush3.bf16.msra.mxu1 %v3045_v36 }
 0x144   : > { %2875 = vmatprep.subr.mxu1 %v3109_v24 }
 0x145   : > { %2249 = vmatpush1.bf16.msra.mxu0 %v2999_v42 }
 0x146   : > { %2250 = vmatprep.subr.bf16.mxu0 %v3004_v44  ;;  %v2622_v44 = vld [vmem:[%s3989_s5] ss:$0 sm:$0xff] }
 0x148   : > { %1653 = vmatmul.mubr.bf16.gmra.mxu0 %v2631_v6 }
 0x149   : > { %2251 = vmatpush1.bf16.msra.mxu0 %v3002_v45 }
 0x14a   : > { %2252 = vmatprep.subr.bf16.mxu0 %v3007_v47  ;;  %v1599_v47 = vadd.f32 %v2771_v3, %v2622_v44 }
 0x14d   : > { %2253 = vmatpush1.bf16.msra.mxu0 %v3005_v48 }
 0x14e   : > { %2254 = vmatprep.subr.bf16.mxu0 %v3010_v16 }
 0x151   : > { %2255 = vmatpush1.bf16.msra.mxu0 %v3008_v38 }
 0x152   : > { %2256 = vmatprep.subr.bf16.mxu0 %v3013_v50 }
 0x155   : > { %2257 = vmatpush1.bf16.msra.mxu0 %v3011_v51  ;;  %v1602_v51 = vadd.f32 %v2774_v26, %v2622_v44 }
 0x156   : > { %2258 = vmatprep.subr.bf16.mxu0 %v3016_v34 }
 0x159   : > { %2259 = vmatpush1.bf16.msra.mxu0 %v3014_v43 }
 0x15a   : > { %2260 = vmatprep.subr.bf16.mxu0 %v3019_v57 }
 0x15d   : > { %2261 = vmatpush1.bf16.msra.mxu0 %v3017_v61 }
 0x15e   : > { %2262 = vmatprep.subr.bf16.mxu0 %v3022_v62 }
 0x161   : > { %2263 = vmatpush2.bf16.msra.mxu0 %v3020_v52 }
 0x162   : > { %2264 = vmatprep.subr.bf16.mxu0 %v3025_v54 }
 0x165   : > { %2265 = vmatpush2.bf16.msra.mxu0 %v3023_v56  ;;  %v2775_v11 = vpop.f32.mrf.mxu1 }
 0x166   : > { %2266 = vmatprep.subr.bf16.mxu0 %v3028_v2 }
 0x167   : > { %v2776_v20 = vpop.f32.mrf.mxu1 }
 0x168   : > { %v2777_v37 = vadd.f32 %v2776_v20, %v2775_v11 }
 0x169   : > { %2267 = vmatpush2.bf16.msra.mxu0 %v3026_v9  ;;  %v2778_v55 = vpop.f32.mrf.mxu1 }
 0x16a   : > { %2268 = vmatprep.subr.bf16.mxu0 %v3031_v13  ;;  %v1607_v52 = vadd.f32 %v2777_v37, %v2622_v44 }
 0x16b   : > { %v2779_v22 = vpop.f32.mrf.mxu1 }
 0x16d   : > { %2269 = vmatpush2.bf16.msra.mxu0 %v3029_v14 }
 0x16e   : > { %2270 = vmatprep.subr.bf16.mxu0 %v3034_v15 }
 0x171   : > { %2271 = vmatpush2.bf16.msra.mxu0 %v3032_v5 }
 0x172   : > { %2272 = vmatprep.subr.bf16.mxu0 %v3037_v10 }
 0x175   : > { %2273 = vmatpush2.bf16.msra.mxu0 %v3035_v17 }
 0x176   : > { %2274 = vmatprep.subr.bf16.mxu0 %v3040_v18  ;;  %v2825_v23 = vpop.f32.mrf.mxu1 }
 0x178   : > { %v2826_v27 = vpop.f32.mrf.mxu1 }
 0x179   : > { %2275 = vmatpush2.bf16.msra.mxu0 %v3038_v19  ;;  %v2827_v28 = vadd.f32 %v2826_v27, %v2825_v23 }
 0x17a   : > { %2276 = vmatprep.subr.bf16.mxu0 %v3043_v12  ;;  %v2828_v29 = vpop.f32.mrf.mxu1 }
 0x17c   : > { %v2829_v58 = vpop.f32.mrf.mxu1 }
 0x17d   : > { %2277 = vmatpush2.bf16.msra.mxu0 %v3041_v21  ;;  %v2830_v7 = vadd.f32 %v2829_v58, %v2828_v29 }
 0x17e   : > { %v2831_v25 = vpop.f32.mrf.mxu1 }
 0x180   : > { %v2832_v30 = vpop.f32.mrf.mxu1 }
 0x181   : > { %v2833_v8 = vadd.f32 %v2832_v30, %v2831_v25 }
 0x182   : > { %v2834_v60 = vpop.f32.mrf.mxu1 }
 0x183   : > { %v2690_v60 = vld [vmem:[%s3991_s7] ss:$0 sm:$0xff] }
 0x184   : > { %v2835_v35 = vpop.f32.mrf.mxu1 }
 0x1e0   : > { %v1108_v53 = vpop.f32.mrf.mxu0 }
 0x1e1   : > { %v2012_v42 = vpack.c.bf16 %v1108_v53, %v1108_v53 }
 0x1e2   : > { %v1110_v40 = vpop.f32.mrf.mxu0 }
 0x1e3   : > { %v2013_v41 = vpack.c.bf16 %v1110_v40, %v1110_v40 }
 0x1e5   : > { %2278 = vmatprep.mubr.bf16.mxu0 %v2013_v41 }
 0x1e6   : > { %2279 = vmatmul.mubr.bf16.vlgmr.msra.gmra.mxu0 %v2012_v42 }
 0x200   : > { %v2797_v6 = vpop.f32.mrf.mxu0 }
 0x202   : > { %v2798_v45 = vpop.f32.mrf.mxu0 }
 0x203   : > { %v2799_v48 = vadd.f32 %v2798_v45, %v2797_v6 }
 0x204   : > { %v2800_v16 = vpop.f32.mrf.mxu0 }
 0x205   : > { %v1647_v38 = vadd.f32 %v2799_v48, %v1599_v47 }
 0x206   : > { %v2801_v50 = vpop.f32.mrf.mxu0 }
 0x207   : > { %v3831_v34 = vadd.f32 %v2827_v28, %v1647_v38  ;;  %v2802_v43 = vadd.f32 %v2801_v50, %v2800_v16  ;;  %v1846_v16 = vadd.s32 1, %v3652_v0  ;;  %v1842_v38 = vmul.u32 3, %v3652_v0 }
 0x208   : > { %v2803_v57 = vpop.f32.mrf.mxu0 }
 0x209   : > { %v1650_v61 = vadd.f32 %v2802_v43, %v1602_v51  ;;  %v1708_v59 = vmax.f32 %v3831_v34, 0.0  ;;  %v1847_v50 = vmul.u32 3, %v1846_v16  ;;  %v1840_v51 = vadd.s32 8, %v3294_v31  ;;  %v3049_v34 = vld [vmem:[%s3992_s8 + $0x100] ss:$8 sps:$4 sm:$0xff]  }
 0x20a   : > { %v2804_v62 = vpop.f32.mrf.mxu0  ;;  %vm1843_vm5 = vcmp.ge.s32.totalorder %v3294_v31, %v1842_v38  ;;  %v1841_v43 = vadd.s32 16, %v3294_v31 }
 0x20b   : > { %v3833_v54 = vadd.f32 %v2830_v7, %v1650_v61  ;;  %v2805_v49 = vadd.f32 %v2804_v62, %v2803_v57  ;;  %vm1848_vm6 = vcmp.lt.s32.totalorder %v3294_v31, %v1847_v50  ;;  %vm1844_vm7 = vcmp.ge.s32.totalorder %v1840_v51, %v1842_v38 }
 0x20c   : > { %v2806_v56 = vpop.f32.mrf.mxu0  ;;  %vm1849_vm8 = vcmp.lt.s32.totalorder %v1840_v51, %v1847_v50  ;;  %vm3860_vm9 = vmand %vm1843_vm5, %vm1848_vm6  ;;  %vm1845_vm11 = vcmp.ge.s32.totalorder %v1841_v43, %v1842_v38  ;;  %vm1850_vm12 = vcmp.lt.s32.totalorder %v1841_v43, %v1847_v50 }
 0x20d   : > { %v1709_v2 = vmax.f32 %v3833_v54, 0.0  ;;  %v1655_v3 = vadd.f32 %v2805_v49, %v1607_v52  ;;  %vm3864_vm10 = vmand %vm1844_vm7, %vm1849_vm8  ;;  %v3051_v54 = vld [vmem:[%s3992_s8 + $0x104] ss:$8 sps:$4 sm:$0xff]  }
 0x20e   : > { %v2807_v4 = vpop.f32.mrf.mxu0  ;;  %vm1853_vm14 = vmand %vm1845_vm11, %vm1850_vm12 }
 0x20f   : > { %v1711_v9 = vpack.c.bf16 %v1709_v2, %v1708_v59  ;;  %v1703_v63 = vadd.f32 %v2833_v8, %v1655_v3 }
 0x211   : > { %v3841_v13 = vmax.f32 %v1703_v63, 0.0  ;;  %2871 = vmatprep.mubr.msk.bf16.mxu1 %vm1729_vm3, %v1711_v9 }
 0x213   : > { %v1712_v26 = vpack.c.bf16 %v3841_v13, %v3841_v13 }
 0x215   : > { %2872 = vmatmul.mubr.msk.bf16.vlgmr.msra.gmra.mxu1 %vm1729_vm3, %v1712_v26 }
 0x216   : > { %2881 = vmatprep.mubr.msk.f32.mxu1 %vm3112_vm15, %v3109_v24 }
 0x2a6   : > { %v3847_v14 = vpop.f32.mrf.mxu0 }
 0x2a8   : > { %v3849_v15 = vpop.f32.mrf.mxu0 }
 0x2aa   : > { %v2284_v5 = vpop.f32.mrf.mxu0 }
 0x2ac   : > { %v2285_v10 = vpop.f32.mrf.mxu0 }
 0x2d5   : > { %v2873_v17 = vpop.f32.mrf.mxu1 }
 0x2d6   : > { %v2689_v18 = vmul.f32 -1.442695, %v2873_v17 }
 0x2d7   : > { %v1770_v19 = vpop.f32.mrf.mxu1 }
 0x2d8   : > { %v2687_v11 = vmul.f32 -1.442695, %v1770_v19  ;;  %3068 = vpow2.f32 %v2689_v18 }
 0x2d9   : > { %v2874_v12 = vpop.f32.mrf.mxu1 }
 0x2da   : > { %3070 = vpow2.f32 %v2687_v11 }
 0x2db   : > { %v1773_v20 = vpop.f32.mrf.mxu1 }
 0x2dc   : > { %v2688_v37 = vmul.f32 -1.442695, %v1773_v20 }
 0x2de   : > { %3072 = vpow2.f32 %v2688_v37  ;;  %v2692_v37 = vsel %vm3864_vm10, 1.0, %v3109_v24 }
 0x2e5   : > { %v3069_v21 = vpop.eup %3068 }
 0x2e6   : > { %v1798_v23 = vadd.f32 1.0, %v3069_v21 }
 0x2e7   : > { %v3071_v55 = vpop.eup %3070 }
 0x2e8   : > { %v1796_v22 = vadd.f32 1.0, %v3071_v55  ;;  %v2693_v55 = vsel %vm1853_vm14, 1.0, %v3109_v24 }
 0x2ea   : > { %3074 = vrcp.f32 %v1796_v22 }
 0x2eb   : > { %v3073_v27 = vpop.eup %3072  ;;  %3076 = vrcp.f32 %v1798_v23 }
 0x2ec   : > { %v1797_v28 = vadd.f32 1.0, %v3073_v27 }
 0x2ee   : > { %3078 = vrcp.f32 %v1797_v28 }
 0x2ef   : > { %3080 = vtanh.f32 %v1770_v19 }
 0x2f0   : > { %3082 = vtanh.f32 %v2873_v17 }
 0x2f1   : > { %3084 = vtanh.f32 %v1773_v20  ;;  %v2691_v20 = vsel %vm3860_vm9, 1.0, %v3109_v24 }
 0x2f7   : > { %v3075_v29 = vpop.eup %3074 }
 0x2f8   : > { %1808 = vrot.lane.b32.xlu0 %v3075_v29, %s3111_s22  ;;  %v3077_v58 = vpop.eup %3076 }
 0x2fb   : > { %v3079_v7 = vpop.eup %3078 }
 0x2fc   : > { %1812 = vrot.lane.b32.xlu0 %v3077_v58, %s3111_s22  ;;  %1810 = vrot.lane.b32.xlu1 %v3079_v7, %s3111_s22  ;;  %v3081_v25 = vpop.eup %3080  ;;  %s2620_s22 = sshll.u32 %s4009_s26, 3 }
 0x2fd   : > { %v3083_v32 = vpop.eup %3082  ;;  %s481_s15 = scalar_lea.vmem %s3997_s13, %s2620_s22 }
 0x2fe   : > { %v3085_v36 = vpop.eup %3084 }
 0x36a   : > { %v1809_v30 = vpop.permute.xlu0 %1808 }
 0x36b   : > { %v1817_v8 = vmul.f32 %v3081_v25, %v1809_v30 }
 0x36d   : > { %v1827_v35 = vmul.f32 %v2690_v60, %v1817_v8 }
 0x36e   : > { %v1813_v53 = vpop.permute.xlu0 %1812  ;;  %v1811_v40 = vpop.permute.xlu1 %1810 }
 0x36f   : > { %v1819_v41 = vmul.f32 %v3083_v32, %v1813_v53  ;;  %v1818_v42 = vmul.f32 %v3085_v36, %v1811_v40  ;;  %v1831_v44 = vsel %vm1830_vm4, %v1827_v35, 0.0 }
 0x370   : > { %1832 = vadd.xlane.f32.xlu1 %v1831_v44 }
 0x371   : > { %v1828_v6 = vmul.f32 %v2690_v60, %v1818_v42  ;;  %v1829_v47 = vmul.f32 %v2690_v60, %v1819_v41 }
 0x373   : > { %v1834_v45 = vsel %vm1830_vm4, %v1828_v6, 0.0  ;;  %v1837_v48 = vsel %vm1830_vm4, %v1829_v47, 0.0  ;;  %vm1938_vm4 = vcmask 195584  }
 0x374   : > { %1835 = vadd.xlane.f32.xlu0 %v1834_v45 }
 0x378   : > { %1838 = vadd.xlane.f32.xlu0 %v1837_v48 }
 0x3f9   : > { %v1833_v61 = vpop.xlane.xlu1 %1832 }
 0x3fa   : > { %v1867_v49 = vsel %vm3860_vm9, %v1833_v61, -1e+30 }
 0x3fb   : > { %v1871_v4 = vsel %vm1870_vm13, %v1867_v49, -inf }
 0x3fd   : > { %v1836_v52 = vpop.xlane.xlu0 %1835 }
 0x3fe   : > { %v1868_v56 = vsel %vm3864_vm10, %v1836_v52, -1e+30 }
 0x3ff   : > { %v1872_v3 = vsel %vm1870_vm13, %v1868_v56, -inf }
 0x400   : > { %v1874_v63 = vmax.f32 %v1871_v4, %v1872_v3 }
 0x401   : > { %v1839_v9 = vpop.xlane.xlu0 %1838 }
 0x402   : > { %v1869_v26 = vsel %vm1853_vm14, %v1839_v9, -1e+30 }
 0x403   : > { %v1873_v5 = vsel %vm1870_vm13, %v1869_v26, -inf }
 0x404   : > { %v1875_v10 = vmax.f32 %v1874_v63, %v1873_v5 }
 0x406   : > { %v1876_v17 = vrot.slane %v1875_v10, 4 }
 0x408   : > { %v1877_v18 = vmax.f32 %v1875_v10, %v1876_v17  ;;  %v1860_v17 = vmul.u32 3, %v3294_v31  ;;  %v3048_v31 = vld [vmem:[%s3992_s8 + $0x114] ss:$8 sps:$4 sm:$0xff]  }
 0x40a   : > { %v1878_v19 = vrot.slane %v1877_v18, 2  ;;  %vm1861_vm0 = vcmp.ge.s32.totalorder %v3652_v0, %v1860_v17 }
 0x40c   : > { %v1879_v11 = vmax.f32 %v1877_v18, %v1878_v19  ;;  %v1862_v18 = vmul.u32 3, %v3643_v46 }
 0x40e   : > { %v1880_v12 = vrot.slane %v1879_v11, 1  ;;  %vm1863_vm1 = vcmp.lt.s32.totalorder %v3652_v0, %v1862_v18 }
 0x40f   : > { %vm1864_vm2 = vmand %vm1861_vm0, %vm1863_vm1 }
 0x410   : > { %v1881_v21 = vmax.f32 %v1879_v11, %v1880_v12  ;;  %v2694_v0 = vsel %vm1864_vm2, 1.0, %v3109_v24 }
 0x412   : > { %v1883_v22 = vmul.f32 %v2692_v37, %v1881_v21  ;;  %v1882_v23 = vmul.f32 %v2691_v20, %v1881_v21  ;;  %v1884_v29 = vmul.f32 %v2693_v55, %v1881_v21 }
 0x414   : > { %v1888_v27 = vsel %vm1870_vm13, %v1883_v22, 0.0  ;;  %v1885_v28 = vsel %vm1870_vm13, %v1882_v23, 0.0  ;;  %v1891_v58 = vsel %vm1870_vm13, %v1884_v29, 0.0  ;;  %v3056_v29 = vld [vmem:[%s3994_s10 + $0x68] sm:$0xff]  }
 0x415   : > { %1889 = vadd.xlane.f32.xlu0 %v1888_v27  ;;  %1886 = vadd.xlane.f32.xlu1 %v1885_v28  ;;  %v3054_v27 = vld [vmem:[%s3994_s10 + $0x70] sm:$0xff]  }
 0x419   : > { %1892 = vadd.xlane.f32.xlu1 %v1891_v58  ;;  %v3057_v58 = vld [vmem:[%s3994_s10 + $0x28] sm:$0xff]  }
 0x49e   : > { %v1890_v7 = vpop.xlane.xlu0 %1889  ;;  %v1887_v25 = vpop.xlane.xlu1 %1886 }
 0x49f   : > { %v1895_v30 = vsub.f32 %v1836_v52, %v1890_v7  ;;  %v1894_v60 = vsub.f32 %v1833_v61, %v1887_v25  ;;  %v3058_v7 = vld [vmem:[%s3994_s10 + $0x60] sm:$0xff]  }
 0x4a0   : > { %v3059_v25 = vld [vmem:[%s3994_s10 + $0x20] sm:$0xff]  }
 0x4a1   : > { %v1899_v8 = vmul.f32 1.442695, %v1895_v30  ;;  %v1897_v32 = vmul.f32 1.442695, %v1894_v60  ;;  %v3060_v30 = vld [vmem:[%s3994_s10 + $0x58] sm:$0xff]  }
 0x4a2   : > { %v1893_v35 = vpop.xlane.xlu1 %1892  ;;  %v3061_v60 = vld [vmem:[%s3994_s10 + $0x18] sm:$0xff]  }
 0x4a3   : > { %3086 = vpow2.f32 %v1899_v8  ;;  %v1896_v36 = vsub.f32 %v1839_v9, %v1893_v35  ;;  %v3062_v8 = vld [vmem:[%s3994_s10 + $0x50] sm:$0xff]   ;;  %v3064_v35 = vld [vmem:[%s3994_s10 + $0x48] sm:$0xff]  }
 0x4a4   : > { %3088 = vpow2.f32 %v1897_v32  ;;  %v3063_v32 = vld [vmem:[%s3994_s10 + $0x10] sm:$0xff]  }
 0x4a5   : > { %v1901_v53 = vmul.f32 1.442695, %v1896_v36  ;;  %v3065_v36 = vld [vmem:[%s3994_s10 + $0x8] sm:$0xff]  }
 0x4a7   : > { %3090 = vpow2.f32 %v1901_v53  ;;  %v3066_v53 = vld [vmem:[%s3994_s10 + $0x40] sm:$0xff]  }
 0x4b0   : > { %v3087_v40 = vpop.eup %3086 }
 0x4b1   : > { %v3089_v41 = vpop.eup %3088  ;;  %v1904_v42 = vmul.f32 %v3087_v40, %v2692_v37 }
 0x4b2   : > { %v1903_v44 = vmul.f32 %v3089_v41, %v2691_v20 }
 0x4b3   : > { %v1907_v6 = vsel %vm1870_vm13, %v1904_v42, 0.0 }
 0x4b4   : > { %v3091_v45 = vpop.eup %3090  ;;  %v1906_v47 = vsel %vm1870_vm13, %v1903_v44, 0.0 }
 0x4b5   : > { %v1905_v48 = vmul.f32 %v3091_v45, %v2693_v55  ;;  %v1908_v16 = vadd.f32 %v1907_v6, %v1906_v47 }
 0x4b7   : > { %v1909_v38 = vsel %vm1870_vm13, %v1905_v48, 0.0 }
 0x4b8   : > { %v1910_v50 = vadd.f32 %v1909_v38, %v1908_v16 }
 0x4ba   : > { %v1911_v51 = vrot.slane %v1910_v50, 4 }
 0x4bc   : > { %v1912_v43 = vadd.f32 %v1911_v51, %v1910_v50 }
 0x4be   : > { %v1913_v57 = vrot.slane %v1912_v43, 2 }
 0x4c0   : > { %v1914_v61 = vadd.f32 %v1913_v57, %v1912_v43 }
 0x4c2   : > { %v1915_v62 = vrot.slane %v1914_v61, 1 }
 0x4c4   : > { %v1916_v52 = vadd.f32 %v1915_v62, %v1914_v61 }
 0x4c6   : > { %v1919_v49 = vmul.f32 %v2693_v55, %v1916_v52  ;;  %v1918_v56 = vmul.f32 %v2692_v37, %v1916_v52  ;;  %v1917_v9 = vmul.f32 %v2691_v20, %v1916_v52 }
 0x4c8   : > { %v1926_v3 = vsel %vm1870_vm13, %v1919_v49, 0.0  ;;  %v1923_v4 = vsel %vm1870_vm13, %v1918_v56, 0.0  ;;  %v1920_v63 = vsel %vm1870_vm13, %v1917_v9, 0.0 }
 0x4c9   : > { %1927 = vadd.xlane.f32.xlu0 %v1926_v3  ;;  %1924 = vadd.xlane.f32.xlu1 %v1923_v4 }
 0x4cd   : > { %1921 = vadd.xlane.f32.xlu0 %v1920_v63 }
 0x552   : > { %v1928_v26 = vpop.xlane.xlu0 %1927  ;;  %v1925_v5 = vpop.xlane.xlu1 %1924 }
 0x553   : > { %3092 = vrcp.f32 %v1928_v26 }
 0x554   : > { %3094 = vrcp.f32 %v1925_v5 }
 0x556   : > { %v1922_v10 = vpop.xlane.xlu0 %1921 }
 0x557   : > { %3096 = vrcp.f32 %v1922_v10 }
 0x560   : > { %v3093_v19 = vpop.eup %3092 }
 0x561   : > { %v3095_v11 = vpop.eup %3094  ;;  %v1934_v12 = vmul.f32 %v3093_v19, %v3091_v45 }
 0x562   : > { %v1933_v20 = vmul.f32 %v3095_v11, %v3087_v40  ;;  %v3067_v40 = vld [vmem:[%s3994_s10] sm:$0xff]  }
 0x563   : > { %v1937_v37 = vmul.f32 %v1934_v12, %v3841_v13  ;;  %v3046_v13 = vld [vmem:[%s3992_s8 + $0x110] ss:$8 sps:$4 sm:$0xff]  }
 0x564   : > { %v3097_v21 = vpop.eup %3096  ;;  %v1936_v55 = vmul.f32 %v1933_v20, %v1709_v2  ;;  %v3053_v2 = vld [vmem:[%s3994_s10 + $0x38] sm:$0xff]  }
 0x565   : > { %2876 = vmatpush3.msra.mxu1 %v1937_v37  ;;  %v1932_v22 = vmul.f32 %v3097_v21, %v3089_v41  ;;  %v2051_v41 = vld [vmem:[%s3993_s9] sm:$0x3] }
 0x566   : > { %2877 = vmatprep.subr.mxu1 %v3109_v24  ;;  %v2056_v42 = vrot.slane %v2051_v41, %v3312_v39  ;;  %v2060_v44 = vrot.slane %v2051_v41, %v3300_v33  ;;  %v2733_v39 = vld [vmem:[%s3995_s11] ss:$0 sm:$0xff] }
 0x567   : > { %2878 = vmatpush3.msra.mxu1 %v1936_v55  ;;  %v1935_v46 = vmul.f32 %v1932_v22, %v1708_v59 }
 0x568   : > { %2879 = vmatprep.subr.mxu1 %v3109_v24  ;;  %v3052_v24 = vld [vmem:[%s3994_s10 + $0x78] sm:$0xff]   ;;  %v2281_v6 = vadd.f32 %v3847_v14, %v2056_v42  ;;  %v2283_v47 = vadd.f32 %v3849_v15, %v2060_v44 }
 0x569   : > { %2880 = vmatpush3.msra.mxu1 %v1935_v46 }
 0x56a   : > { %2882 = vmatmul.mubr.msk.f32.vlgmr.msra.gmra.mxu1 %vm1938_vm4, %v2694_v0  ;;  %2299 = vmatprep.subr.bf16.mxu1 %v3048_v31 }
 0x56b   : > { %2300 = vmatpush1.bf16.msra.mxu1 %v3046_v13  ;;  %2319 = vmatprep.mubr.bf16.mxu1 %v3107_v1  ;;  %v3055_v1 = vld [vmem:[%s3994_s10 + $0x30] sm:$0xff]  }
 0x56c   : > { %2301 = vmatprep.subr.bf16.mxu1 %v3051_v54 }
 0x56f   : > { %2302 = vmatpush1.bf16.msra.mxu1 %v3049_v34 }
 0x570   : > { %2845 = vmatprep.subr.bf16.mxu1 %v3052_v24 }
 0x62a   : > { %v2008_v59 = vpop.f32.mrf.mxu1 }
 0x62b   : > { %v2014_v23 = vpack.c.bf16 %v2008_v59, %v2008_v59 }
 0x62c   : > { %v2883_v28 = vpop.f32.mrf.mxu1 }
 0x62d   : > { %2732 = vmatmul.mubr.msk.bf16.vlgmr.msra.gmra.mxu1 %vm1729_vm3, %v2014_v23 }
 0x62e   : > { %2846 = vmatpush3.bf16.msra.mxu1 %v3053_v2 }
 0x62f   : > { %2847 = vmatprep.subr.bf16.mxu1 %v3054_v27 }
 0x632   : > { %2848 = vmatpush3.bf16.msra.mxu1 %v3055_v1 }
 0x633   : > { %2849 = vmatprep.subr.bf16.mxu1 %v3056_v29 }
 0x636   : > { %2850 = vmatpush3.bf16.msra.mxu1 %v3057_v58 }
 0x637   : > { %2851 = vmatprep.subr.bf16.mxu1 %v3058_v7 }
 0x63a   : > { %2852 = vmatpush3.bf16.msra.mxu1 %v3059_v25 }
 0x63b   : > { %2853 = vmatprep.subr.bf16.mxu1 %v3060_v30 }
 0x63e   : > { %2854 = vmatpush3.bf16.msra.mxu1 %v3061_v60 }
 0x63f   : > { %2855 = vmatprep.subr.bf16.mxu1 %v3062_v8 }
 0x642   : > { %2856 = vmatpush3.bf16.msra.mxu1 %v3063_v32 }
 0x643   : > { %2857 = vmatprep.subr.bf16.mxu1 %v3064_v35 }
 0x646   : > { %2858 = vmatpush3.bf16.msra.mxu1 %v3065_v36 }
 0x647   : > { %2859 = vmatprep.subr.bf16.mxu1 %v3066_v53 }
 0x64a   : > { %2860 = vmatpush3.bf16.msra.mxu1 %v3067_v40 }
 0x6ed   : > { %v2321_v45 = vpop.f32.mrf.mxu1 }
 0x6ee   : > { %v2322_v48 = vadd.f32 %v2321_v45, %v2281_v6 }
 0x6ef   : > { %v2323_v16 = vpop.f32.mrf.mxu1 }
 0x6f0   : > { %v2324_v38 = vadd.f32 %v2323_v16, %v2283_v47  ;;  %v2328_v50 = vmax.f32 %v2322_v48, 0.0 }
 0x6f1   : > { %v2325_v51 = vpop.f32.mrf.mxu1 }
 0x6f2   : > { %v2329_v43 = vmax.f32 %v2324_v38, 0.0  ;;  %v2330_v62 = vpack.c.bf16 %v2328_v50, %v2328_v50 }
 0x6f3   : > { %v2326_v57 = vpop.f32.mrf.mxu1 }
 0x6f4   : > { %v2331_v61 = vpack.c.bf16 %v2329_v43, %v2329_v43 }
 0x6f6   : > { %2499 = vmatprep.mubr.bf16.mxu1 %v2331_v61 }
 0x6f7   : > { %2500 = vmatmul.mubr.bf16.vlgmr.msra.gmra.mxu1 %v2330_v62 }
 0x7b7   : > { %v2861_v33 = vpop.f32.mrf.mxu1 }
 0x7b9   : > { %v2862_v14 = vpop.f32.mrf.mxu1 }
 0x7ba   : > { %v2863_v15 = vadd.f32 %v2862_v14, %v2861_v33 }
 0x7bb   : > { %v2864_v52 = vpop.f32.mrf.mxu1 }
 0x7bc   : > { %v2502_v49 = vadd.f32 %v2863_v15, %v2733_v39 }
 0x7bd   : > { %v2865_v56 = vpop.f32.mrf.mxu1 }
 0x7be   : > { %2507 = vst [vmem:[%s481_s15] sm:$0xff] %v2502_v49 }
 0x7bf PF: > { %s24_s25 = sadd.s32 1, %s3104_s25  }
 0x7c0   : > { %p21_p6 = scmp.ge.s32.totalorder %s24_s25, 4  }
 0x7c2   :  { %23 = sbr.rel (!%p21_p6) target bundleno = 1 (0x1), region = 113 }

</bundles_post_ra>
